<compile_context>
chip_gen: v7x
topology: tpu7x:2x2x1
jax: 0.10.0
libtpu: 0.0.40
codegen_flags: <defaults>
</compile_context>

<pallas_src>
import functools

import jax
import jax.numpy as jnp
from jax import lax
from jax.experimental import pallas as pl
from jax.experimental.pallas import tpu as pltpu


# ------------------------------ encoder kernel ------------------------------

def encoder_kernel(x_ref, ln_ref, wqkv_ref, fc_ref,
                   gwy_ref, gby_ref, gwx_ref, gbx_ref,
                   gwg_ref, gbgg_ref, gbg_ref,
                   w1_ref, b1_ref, w2_ref, b2_ref,
                   o_ref, act_ref,
                   *, bt, seq, d_model, n_head, d_k, d_v, compute_dtype):
    l = pl.program_id(1)
    m = bt * seq
    D = d_model

    def mm(a, b):
        return jnp.dot(a.astype(compute_dtype), b.astype(compute_dtype),
                       preferred_element_type=jnp.float32)

    def bmm(eq, a, b):
        return jnp.einsum(eq, a.astype(compute_dtype), b.astype(compute_dtype),
                          preferred_element_type=jnp.float32)

    # Layer 0 of this batch tile: load activations into the resident scratch.
    @pl.when(l == 0)
    def _():
        act_ref[...] = x_ref[...].reshape(m, D)

    x = act_ref[...]                                     # (M, D)

    # Per-layer weights (leading layer-block dim of size 1 squeezed off).
    ln = ln_ref[0]                                       # (2, 2, D)
    wqkv = wqkv_ref[0]                                   # (D, 2*H*dk + H*dv)
    fc = fc_ref[0]                                       # (H*dv, D)
    gwy = gwy_ref[0]                                     # (2, D, 3D)
    gby = gby_ref[0]                                     # (2, 1, 3D)
    gwx = gwx_ref[0]                                     # (2, D, 2D)
    gbx = gbx_ref[0]                                     # (2, 1, 2D)
    gwg = gwg_ref[0]                                     # (2, D, D)
    gbgg = gbgg_ref[0]                                   # (2, 1, D)
    gbg = gbg_ref[0]                                     # (2, 1, D)
    w1 = w1_ref[0]                                       # (D, Dh)
    b1 = b1_ref[0]                                       # (1, Dh)
    w2 = w2_ref[0]                                       # (Dh, D)
    b2 = b2_ref[0]                                       # (1, D)

    def layernorm(v, gamma, beta):
        mean = jnp.mean(v, axis=-1, keepdims=True)
        var = jnp.mean((v - mean) ** 2, axis=-1, keepdims=True)
        return (v - mean) * lax.rsqrt(var + 1e-6) * gamma + beta

    def gru_gate(g, xin, yin):
        # y-side: [Wr|Wz|Wg], x-side: [Ur|Uz], plus (r*x)@Ug  -> 3 fused matmuls.
        ylin = mm(yin, gwy[g]) + gby[g]                  # (M, 3D)
        xlin = mm(xin, gwx[g]) + gbx[g]                  # (M, 2D)
        r = jax.nn.sigmoid(ylin[:, 0:D] + xlin[:, 0:D])
        z = jax.nn.sigmoid(ylin[:, D:2 * D] + xlin[:, D:2 * D] - gbg[g])
        h = jnp.tanh(ylin[:, 2 * D:3 * D] + mm(r * xin, gwg[g]) + gbgg[g])
        return (1.0 - z) * xin + z * h

    # ---- norm1 + fused QKV projection ----
    xn = layernorm(x, ln[0, 0:1, :], ln[0, 1:2, :])
    qkv = mm(xn, wqkv)                                   # (M, 2*H*dk + H*dv)
    hk = n_head * d_k
    q = qkv[:, 0:hk]
    k = qkv[:, hk:2 * hk]
    v = qkv[:, 2 * hk:2 * hk + n_head * d_v]

    # ---- multi-head attention (heads unrolled, batch folded into einsum) ----
    inv_temp = 1.0 / (d_k ** 0.5)
    attn_fc = jnp.zeros((m, D), jnp.float32)
    for h in range(n_head):
        qh = (q[:, h * d_k:(h + 1) * d_k] * inv_temp).reshape(bt, seq, d_k)
        kh = k[:, h * d_k:(h + 1) * d_k].reshape(bt, seq, d_k)
        vh = v[:, h * d_v:(h + 1) * d_v].reshape(bt, seq, d_v)
        s = bmm('bqd,bkd->bqk', qh, kh)                  # (Bt, S, S)
        s = s - jnp.max(s, axis=-1, keepdims=True)
        p = jnp.exp(s)
        denom = jnp.sum(p, axis=-1, keepdims=True)       # (Bt, S, 1)
        oh = bmm('bqk,bkd->bqd', p, vh)                  # (Bt, S, dv)
        # normalize after the PV matmul (row-scale the smaller tensor, EUP recip)
        oh = oh * pl.reciprocal(denom, approx=True)
        # fold this head's output straight through its slice of the fc weight
        attn_fc = attn_fc + mm(oh.reshape(m, d_v), fc[h * d_v:(h + 1) * d_v, :])

    # ---- GRU gate 1 (residual replacement) ----
    out1 = gru_gate(0, x, attn_fc)

    # ---- norm2 + position-wise feed forward ----
    xn2 = layernorm(out1, ln[1, 0:1, :], ln[1, 1:2, :])
    hid = jnp.maximum(mm(xn2, w1) + b1, 0.0)
    ffn = mm(hid, w2) + b2

    # ---- GRU gate 2 ----
    out = gru_gate(1, out1, ffn)

    # Carry the activation to the next layer; emit output on the last layer.
    act_ref[...] = out

    @pl.when(l == pl.num_programs(1) - 1)
    def _():
        o_ref[...] = out.reshape(bt, seq, D).astype(o_ref.dtype)


# ------------------------------ wrapper ------------------------------------

def encoder_forward(x, params, *, n_head, d_k, d_v, batch_tile=None,
                    compute_dtype=jnp.float32):
    """Encoder.forward with return_attns=False: returns (enc_output,)."""
    (ln, wqkv, fc, gwy, gby, gwx, gbx, gwg, gbgg, gbg, w1, b1, w2, b2) = params
    B, S, D = x.shape
    L = ln.shape[0]
    bt = batch_tile if batch_tile is not None else B
    assert B % bt == 0, "batch must be divisible by batch_tile"

    kernel = functools.partial(
        encoder_kernel, bt=bt, seq=S, d_model=D,
        n_head=n_head, d_k=d_k, d_v=d_v, compute_dtype=compute_dtype)

    def weight_spec(p):
        nd = p.ndim
        blk = (1,) + p.shape[1:]
        return pl.BlockSpec(blk, lambda b, l, _nd=nd: (l,) + (0,) * (_nd - 1))

    in_specs = [pl.BlockSpec((bt, S, D), lambda b, l: (b, 0, 0))]
    in_specs += [weight_spec(p) for p in params]
    out_specs = pl.BlockSpec((bt, S, D), lambda b, l: (b, 0, 0))

    # VMEM budget: double-buffered per-layer weights + in/out activation tiles
    # + scratch + headroom (kept <= 64 MiB so it is valid on v7x as well).
    weight_bytes = sum(int(p.nbytes) // L for p in params)
    act_bytes = bt * S * D * x.dtype.itemsize
    vmem_limit = int(min(64 * 1024 * 1024,
                         max(16 * 1024 * 1024,
                             2 * weight_bytes + 8 * act_bytes + 8 * 1024 * 1024)))

    out = pl.pallas_call(
        kernel,
        out_shape=jax.ShapeDtypeStruct((B, S, D), x.dtype),
        grid=(B // bt, L),
        in_specs=in_specs,
        out_specs=out_specs,
        scratch_shapes=[pltpu.VMEM((bt * S, D), jnp.float32)],
        compiler_params=pltpu.CompilerParams(
            dimension_semantics=("parallel", "arbitrary"),
            vmem_limit_bytes=vmem_limit),
    )(x, *params)
    return (out,)


# ------------------------------ parameter init ------------------------------

def init_encoder_params(key, n_layers, d_model, d_hidden, n_head, d_k, d_v):
    """Random packed parameters, stacked along a leading layer axis."""
    D = d_model

    def one_layer(k):
        ks = jax.random.split(k, 12)
        scale = 0.1
        mat = lambda kk, shape: jax.random.normal(kk, shape, jnp.float32) * scale
        ones = jnp.ones((D,), jnp.float32)
        zeros = jnp.zeros((D,), jnp.float32)
        ln = jnp.stack([jnp.stack([ones, zeros]),        # norm1 gamma/beta
                        jnp.stack([ones, zeros])])       # norm2 gamma/beta
        wqkv = mat(ks[0], (D, 2 * n_head * d_k + n_head * d_v))
        fc = mat(ks[1], (n_head * d_v, D))
        gwy = mat(ks[2], (2, D, 3 * D))                  # per gate [Wr|Wz|Wg]
        gby = mat(ks[3], (2, 1, 3 * D))
        gwx = mat(ks[4], (2, D, 2 * D))                  # per gate [Ur|Uz]
        gbx = mat(ks[5], (2, 1, 2 * D))
        gwg = mat(ks[6], (2, D, D))                      # per gate Ug
        gbgg = mat(ks[7], (2, 1, D))
        gbg = jnp.full((2, 1, D), 2.0, jnp.float32)      # bg = 2
        w1 = mat(ks[8], (D, d_hidden))
        b1 = mat(ks[9], (1, d_hidden))
        w2 = mat(ks[10], (d_hidden, D))
        b2 = mat(ks[11], (1, D))
        return (ln, wqkv, fc, gwy, gby, gwx, gbx, gwg, gbgg, gbg, w1, b1, w2, b2)

    layers = [one_layer(k) for k in jax.random.split(key, n_layers)]
    return tuple(jnp.stack([lyr[i] for lyr in layers])
                 for i in range(len(layers[0])))


# ------------------------------ pure-JAX reference ---------------------------

def ref_encoder(x, params, n_head, d_k, d_v):
    (ln, wqkv, fc, gwy, gby, gwx, gbx, gwg, gbgg, gbg, w1, b1, w2, b2) = params
    L = ln.shape[0]
    B, S, D = x.shape
    hk = n_head * d_k

    def layernorm(v, g, b):
        m = v.mean(-1, keepdims=True)
        var = ((v - m) ** 2).mean(-1, keepdims=True)
        return (v - m) / jnp.sqrt(var + 1e-6) * g + b

    def gate(lw_y, lb_y, lw_x, lb_x, lw_g, lb_g, lbg, xin, yin):
        ylin = yin @ lw_y + lb_y
        xlin = xin @ lw_x + lb_x
        r = jax.nn.sigmoid(ylin[..., :D] + xlin[..., :D])
        z = jax.nn.sigmoid(ylin[..., D:2 * D] + xlin[..., D:2 * D] - lbg)
        h = jnp.tanh(ylin[..., 2 * D:] + (r * xin) @ lw_g + lb_g)
        return (1 - z) * xin + z * h

    for l in range(L):
        xn = layernorm(x, ln[l, 0, 0], ln[l, 0, 1])
        qkv = xn @ wqkv[l]
        q = qkv[..., :hk].reshape(B, S, n_head, d_k).transpose(0, 2, 1, 3)
        k = qkv[..., hk:2 * hk].reshape(B, S, n_head, d_k).transpose(0, 2, 1, 3)
        v = qkv[..., 2 * hk:].reshape(B, S, n_head, d_v).transpose(0, 2, 1, 3)
        attn = jax.nn.softmax(
            jnp.einsum('bhqd,bhkd->bhqk', q / (d_k ** 0.5), k), axis=-1)
        o = jnp.einsum('bhqk,bhkd->bhqd', attn, v)
        o = o.transpose(0, 2, 1, 3).reshape(B, S, n_head * d_v) @ fc[l]
        out1 = gate(gwy[l, 0], gby[l, 0], gwx[l, 0], gbx[l, 0],
                    gwg[l, 0], gbgg[l, 0], gbg[l, 0], x, o)
        xn2 = layernorm(out1, ln[l, 1, 0], ln[l, 1, 1])
        ffn = jnp.maximum(xn2 @ w1[l] + b1[l], 0.0) @ w2[l] + b2[l]
        x = gate(gwy[l, 1], gby[l, 1], gwx[l, 1], gbx[l, 1],
                 gwg[l, 1], gbgg[l, 1], gbg[l, 1], out1, ffn)
    return x


# ------------------------------------ main -----------------------------------

if __name__ == "__main__":
    # small shapes consistent with the module
    B, S = 2, 8
    d_model, d_hidden = 32, 64
    n_layers, n_head, d_k, d_v = 2, 2, 16, 16

    root = jax.random.PRNGKey(0)
    kx, kp = jax.random.split(root)
    x = jax.random.normal(kx, (B, S, d_model), jnp.float32)
    params = init_encoder_params(kp, n_layers, d_model, d_hidden,
                                 n_head, d_k, d_v)

    # compute_dtype=jnp.bfloat16 is recommended on v6e/v7x for MXU throughput;
    # the test keeps f32 so the reference comparison stays tight.
    (out,) = encoder_forward(x, params, n_head=n_head, d_k=d_k, d_v=d_v,
                             compute_dtype=jnp.float32)
    out = jax.block_until_ready(out)

    ref = ref_encoder(x, params, n_head, d_k, d_v)
    assert out.shape == (B, S, d_model)
    max_diff = jnp.max(jnp.abs(out - ref))
    # tolerance slightly loosened vs. 1e-4 because of the approx (EUP) softmax
    # reciprocal inside the kernel.
    assert jnp.allclose(out, ref, atol=2e-3, rtol=2e-3), (
        f"max abs diff {max_diff}")

    print("KERNEL_OK")
</pallas_src>

<mosaic_0001>
module attributes {stable_mosaic.version = 11 : i64} {
  func.func @encoder_kernel(%arg0: i32, %arg1: i32, %arg2: memref<2x8x32xf32, #tpu.memory_space<vmem>>, %arg3: memref<1x2x2x32xf32, #tpu.memory_space<vmem>>, %arg4: memref<1x32x96xf32, #tpu.memory_space<vmem>>, %arg5: memref<1x32x32xf32, #tpu.memory_space<vmem>>, %arg6: memref<1x2x32x96xf32, #tpu.memory_space<vmem>>, %arg7: memref<1x2x1x96xf32, #tpu.memory_space<vmem>>, %arg8: memref<1x2x32x64xf32, #tpu.memory_space<vmem>>, %arg9: memref<1x2x1x64xf32, #tpu.memory_space<vmem>>, %arg10: memref<1x2x32x32xf32, #tpu.memory_space<vmem>>, %arg11: memref<1x2x1x32xf32, #tpu.memory_space<vmem>>, %arg12: memref<1x2x1x32xf32, #tpu.memory_space<vmem>>, %arg13: memref<1x32x64xf32, #tpu.memory_space<vmem>>, %arg14: memref<1x1x64xf32, #tpu.memory_space<vmem>>, %arg15: memref<1x64x32xf32, #tpu.memory_space<vmem>>, %arg16: memref<1x1x32xf32, #tpu.memory_space<vmem>>, %arg17: memref<2x8x32xf32, #tpu.memory_space<vmem>>, %arg18: memref<16x32xf32, #tpu.memory_space<vmem>>) attributes {dimension_semantics = [#tpu.dimension_semantics<parallel>, #tpu.dimension_semantics<arbitrary>], iteration_bounds = array<i64: 1, 2>, scalar_prefetch = 0 : i64, scratch_operands = 1 : i64, tpu.core_type = #tpu.core_type<tc>, window_params = [{transform_indices = @transform_0, window_bounds = array<i64: 2, 8, 32>}, {transform_indices = @transform_1, window_bounds = array<i64: 1, 2, 2, 32>}, {transform_indices = @transform_2, window_bounds = array<i64: 1, 32, 96>}, {transform_indices = @transform_3, window_bounds = array<i64: 1, 32, 32>}, {transform_indices = @transform_4, window_bounds = array<i64: 1, 2, 32, 96>}, {transform_indices = @transform_5, window_bounds = array<i64: 1, 2, 1, 96>}, {transform_indices = @transform_6, window_bounds = array<i64: 1, 2, 32, 64>}, {transform_indices = @transform_7, window_bounds = array<i64: 1, 2, 1, 64>}, {transform_indices = @transform_8, window_bounds = array<i64: 1, 2, 32, 32>}, {transform_indices = @transform_9, window_bounds = array<i64: 1, 2, 1, 32>}, {transform_indices = @transform_10, window_bounds = array<i64: 1, 2, 1, 32>}, {transform_indices = @transform_11, window_bounds = array<i64: 1, 32, 64>}, {transform_indices = @transform_12, window_bounds = array<i64: 1, 1, 64>}, {transform_indices = @transform_13, window_bounds = array<i64: 1, 64, 32>}, {transform_indices = @transform_14, window_bounds = array<i64: 1, 1, 32>}, {transform_indices = @transform_15, window_bounds = array<i64: 2, 8, 32>}]} {
    %c0_i32 = arith.constant 0 : i32
    %0 = arith.cmpi eq, %arg1, %c0_i32 : i32
    %1 = arith.extui %0 : i1 to i32
    %c0_i32_0 = arith.constant 0 : i32
    %2 = arith.cmpi ne, %1, %c0_i32_0 : i32
    scf.if %2 {
      %c0_93 = arith.constant 0 : index
      %c0_94 = arith.constant 0 : index
      %c0_95 = arith.constant 0 : index
      %249 = vector.load %arg2[%c0_93, %c0_94, %c0_95] : memref<2x8x32xf32, #tpu.memory_space<vmem>>, vector<2x8x32xf32>
      %250 = vector.shape_cast %249 : vector<2x8x32xf32> to vector<16x32xf32>
      %c0_96 = arith.constant 0 : index
      %c0_97 = arith.constant 0 : index
      %251 = vector.load %arg18[%c0_96, %c0_97] : memref<16x32xf32, #tpu.memory_space<vmem>>, vector<16x32xf32>
      tpu.vector_store %arg18[%c0_96, %c0_97], %250 {strides = array<i32>} : memref<16x32xf32, #tpu.memory_space<vmem>>, vector<16x32xf32>,
    } else {
    }
    %c0 = arith.constant 0 : index
    %c0_1 = arith.constant 0 : index
    %3 = vector.load %arg18[%c0, %c0_1] : memref<16x32xf32, #tpu.memory_space<vmem>>, vector<16x32xf32>
    %c0_2 = arith.constant 0 : index
    %c0_3 = arith.constant 0 : index
    %c0_4 = arith.constant 0 : index
    %c0_5 = arith.constant 0 : index
    %4 = vector.load %arg3[%c0_2, %c0_3, %c0_4, %c0_5] : memref<1x2x2x32xf32, #tpu.memory_space<vmem>>, vector<1x2x2x32xf32>
    %5 = vector.shape_cast %4 : vector<1x2x2x32xf32> to vector<2x2x32xf32>
    %c0_6 = arith.constant 0 : index
    %c0_7 = arith.constant 0 : index
    %c0_8 = arith.constant 0 : index
    %6 = vector.load %arg4[%c0_6, %c0_7, %c0_8] : memref<1x32x96xf32, #tpu.memory_space<vmem>>, vector<1x32x96xf32>
    %7 = vector.shape_cast %6 : vector<1x32x96xf32> to vector<32x96xf32>
    %c0_9 = arith.constant 0 : index
    %c0_10 = arith.constant 0 : index
    %c0_11 = arith.constant 0 : index
    %8 = vector.load %arg5[%c0_9, %c0_10, %c0_11] : memref<1x32x32xf32, #tpu.memory_space<vmem>>, vector<1x32x32xf32>
    %9 = vector.shape_cast %8 : vector<1x32x32xf32> to vector<32x32xf32>
    %c0_12 = arith.constant 0 : index
    %c0_13 = arith.constant 0 : index
    %c0_14 = arith.constant 0 : index
    %c0_15 = arith.constant 0 : index
    %10 = vector.load %arg6[%c0_12, %c0_13, %c0_14, %c0_15] : memref<1x2x32x96xf32, #tpu.memory_space<vmem>>, vector<1x2x32x96xf32>
    %11 = vector.shape_cast %10 : vector<1x2x32x96xf32> to vector<2x32x96xf32>
    %c0_16 = arith.constant 0 : index
    %c0_17 = arith.constant 0 : index
    %c0_18 = arith.constant 0 : index
    %c0_19 = arith.constant 0 : index
    %12 = vector.load %arg7[%c0_16, %c0_17, %c0_18, %c0_19] : memref<1x2x1x96xf32, #tpu.memory_space<vmem>>, vector<1x2x1x96xf32>
    %13 = vector.shape_cast %12 : vector<1x2x1x96xf32> to vector<2x1x96xf32>
    %c0_20 = arith.constant 0 : index
    %c0_21 = arith.constant 0 : index
    %c0_22 = arith.constant 0 : index
    %c0_23 = arith.constant 0 : index
    %14 = vector.load %arg8[%c0_20, %c0_21, %c0_22, %c0_23] : memref<1x2x32x64xf32, #tpu.memory_space<vmem>>, vector<1x2x32x64xf32>
    %15 = vector.shape_cast %14 : vector<1x2x32x64xf32> to vector<2x32x64xf32>
    %c0_24 = arith.constant 0 : index
    %c0_25 = arith.constant 0 : index
    %c0_26 = arith.constant 0 : index
    %c0_27 = arith.constant 0 : index
    %16 = vector.load %arg9[%c0_24, %c0_25, %c0_26, %c0_27] : memref<1x2x1x64xf32, #tpu.memory_space<vmem>>, vector<1x2x1x64xf32>
    %17 = vector.shape_cast %16 : vector<1x2x1x64xf32> to vector<2x1x64xf32>
    %c0_28 = arith.constant 0 : index
    %c0_29 = arith.constant 0 : index
    %c0_30 = arith.constant 0 : index
    %c0_31 = arith.constant 0 : index
    %18 = vector.load %arg10[%c0_28, %c0_29, %c0_30, %c0_31] : memref<1x2x32x32xf32, #tpu.memory_space<vmem>>, vector<1x2x32x32xf32>
    %19 = vector.shape_cast %18 : vector<1x2x32x32xf32> to vector<2x32x32xf32>
    %c0_32 = arith.constant 0 : index
    %c0_33 = arith.constant 0 : index
    %c0_34 = arith.constant 0 : index
    %c0_35 = arith.constant 0 : index
    %20 = vector.load %arg11[%c0_32, %c0_33, %c0_34, %c0_35] : memref<1x2x1x32xf32, #tpu.memory_space<vmem>>, vector<1x2x1x32xf32>
    %21 = vector.shape_cast %20 : vector<1x2x1x32xf32> to vector<2x1x32xf32>
    %c0_36 = arith.constant 0 : index
    %c0_37 = arith.constant 0 : index
    %c0_38 = arith.constant 0 : index
    %c0_39 = arith.constant 0 : index
    %22 = vector.load %arg12[%c0_36, %c0_37, %c0_38, %c0_39] : memref<1x2x1x32xf32, #tpu.memory_space<vmem>>, vector<1x2x1x32xf32>
    %23 = vector.shape_cast %22 : vector<1x2x1x32xf32> to vector<2x1x32xf32>
    %c0_40 = arith.constant 0 : index
    %c0_41 = arith.constant 0 : index
    %c0_42 = arith.constant 0 : index
    %24 = vector.load %arg13[%c0_40, %c0_41, %c0_42] : memref<1x32x64xf32, #tpu.memory_space<vmem>>, vector<1x32x64xf32>
    %25 = vector.shape_cast %24 : vector<1x32x64xf32> to vector<32x64xf32>
    %c0_43 = arith.constant 0 : index
    %c0_44 = arith.constant 0 : index
    %c0_45 = arith.constant 0 : index
    %26 = vector.load %arg14[%c0_43, %c0_44, %c0_45] : memref<1x1x64xf32, #tpu.memory_space<vmem>>, vector<1x1x64xf32>
    %27 = vector.shape_cast %26 : vector<1x1x64xf32> to vector<1x64xf32>
    %c0_46 = arith.constant 0 : index
    %c0_47 = arith.constant 0 : index
    %c0_48 = arith.constant 0 : index
    %28 = vector.load %arg15[%c0_46, %c0_47, %c0_48] : memref<1x64x32xf32, #tpu.memory_space<vmem>>, vector<1x64x32xf32>
    %29 = vector.shape_cast %28 : vector<1x64x32xf32> to vector<64x32xf32>
    %c0_49 = arith.constant 0 : index
    %c0_50 = arith.constant 0 : index
    %c0_51 = arith.constant 0 : index
    %30 = vector.load %arg16[%c0_49, %c0_50, %c0_51] : memref<1x1x32xf32, #tpu.memory_space<vmem>>, vector<1x1x32xf32>
    %31 = vector.shape_cast %30 : vector<1x1x32xf32> to vector<1x32xf32>
    %32 = vector.extract_strided_slice %5 {offsets = [0, 0, 0], sizes = [1, 1, 32], strides = [1, 1, 1]} : vector<2x2x32xf32> to vector<1x1x32xf32>
    %33 = vector.shape_cast %32 : vector<1x1x32xf32> to vector<1x32xf32>
    %34 = vector.extract_strided_slice %5 {offsets = [0, 1, 0], sizes = [1, 1, 32], strides = [1, 1, 1]} : vector<2x2x32xf32> to vector<1x1x32xf32>
    %35 = vector.shape_cast %34 : vector<1x1x32xf32> to vector<1x32xf32>
    %cst = arith.constant dense<0.000000e+00> : vector<16xf32>
    %36 = vector.multi_reduction <add>, %3, %cst [1] : vector<16x32xf32> to vector<16xf32>
    %37 = vector.shape_cast %36 : vector<16xf32> to vector<16x1xf32>
    %cst_52 = arith.constant 3.200000e+01 : f32
    %38 = vector.broadcast %cst_52 : f32 to vector<16x1xf32>
    %39 = arith.divf %37, %38 : vector<16x1xf32>
    %40 = vector.broadcast %39 : vector<16x1xf32> to vector<16x32xf32>
    %41 = arith.subf %3, %40 : vector<16x32xf32>
    %42 = arith.mulf %41, %41 : vector<16x32xf32>
    %cst_53 = arith.constant dense<0.000000e+00> : vector<16xf32>
    %43 = vector.multi_reduction <add>, %42, %cst_53 [1] : vector<16x32xf32> to vector<16xf32>
    %44 = vector.shape_cast %43 : vector<16xf32> to vector<16x1xf32>
    %cst_54 = arith.constant 3.200000e+01 : f32
    %45 = vector.broadcast %cst_54 : f32 to vector<16x1xf32>
    %46 = arith.divf %44, %45 : vector<16x1xf32>
    %47 = vector.broadcast %39 : vector<16x1xf32> to vector<16x32xf32>
    %48 = arith.subf %3, %47 : vector<16x32xf32>
    %cst_55 = arith.constant 9.99999997E-7 : f32
    %49 = vector.broadcast %cst_55 : f32 to vector<16x1xf32>
    %50 = arith.addf %46, %49 : vector<16x1xf32>
    %51 = math.rsqrt %50 : vector<16x1xf32>
    %52 = vector.broadcast %51 : vector<16x1xf32> to vector<16x32xf32>
    %53 = arith.mulf %48, %52 : vector<16x32xf32>
    %54 = vector.broadcast %33 : vector<1x32xf32> to vector<16x32xf32>
    %55 = arith.mulf %53, %54 : vector<16x32xf32>
    %56 = vector.broadcast %35 : vector<1x32xf32> to vector<16x32xf32>
    %57 = arith.addf %55, %56 : vector<16x32xf32>
    %cst_56 = arith.constant dense<0.000000e+00> : vector<16x96xf32>
    %58 = tpu.matmul %57, %7, %cst_56 {dimension_numbers = #tpu.dot_dimension_numbers<[1], [0], [0], [1], [0, 0, 1, 1], [], []>} : vector<16x32xf32>, vector<32x96xf32>, vector<16x96xf32> -> vector<16x96xf32>
    %59 = vector.extract_strided_slice %58 {offsets = [0, 0], sizes = [16, 32], strides = [1, 1]} : vector<16x96xf32> to vector<16x32xf32>
    %60 = vector.extract_strided_slice %58 {offsets = [0, 32], sizes = [16, 32], strides = [1, 1]} : vector<16x96xf32> to vector<16x32xf32>
    %61 = vector.extract_strided_slice %58 {offsets = [0, 64], sizes = [16, 32], strides = [1, 1]} : vector<16x96xf32> to vector<16x32xf32>
    %cst_57 = arith.constant 0.000000e+00 : f32
    %62 = vector.broadcast %cst_57 : f32 to vector<16x32xf32>
    %63 = vector.extract_strided_slice %59 {offsets = [0, 0], sizes = [16, 16], strides = [1, 1]} : vector<16x32xf32> to vector<16x16xf32>
    %cst_58 = arith.constant 2.500000e-01 : f32
    %64 = vector.broadcast %cst_58 : f32 to vector<16x16xf32>
    %65 = arith.mulf %63, %64 : vector<16x16xf32>
    %66 = vector.shape_cast %65 : vector<16x16xf32> to vector<2x8x16xf32>
    %67 = vector.extract_strided_slice %60 {offsets = [0, 0], sizes = [16, 16], strides = [1, 1]} : vector<16x32xf32> to vector<16x16xf32>
    %68 = vector.shape_cast %67 : vector<16x16xf32> to vector<2x8x16xf32>
    %69 = vector.extract_strided_slice %61 {offsets = [0, 0], sizes = [16, 16], strides = [1, 1]} : vector<16x32xf32> to vector<16x16xf32>
    %70 = vector.shape_cast %69 : vector<16x16xf32> to vector<2x8x16xf32>
    "tpu.trace_start"() <{level = 10 : i32, message = "bqd,bkd->bqk"}> : () -> ()
    %cst_59 = arith.constant dense<0.000000e+00> : vector<2x8x8xf32>
    %71 = tpu.matmul %66, %68, %cst_59 {dimension_numbers = #tpu.dot_dimension_numbers<[2], [2], [1], [1], [0, 0, 0, 1, 1, 1], [0], [0]>} : vector<2x8x16xf32>, vector<2x8x16xf32>, vector<2x8x8xf32> -> vector<2x8x8xf32>
    "tpu.trace_stop"() : () -> ()
    %cst_60 = arith.constant dense<0xFF800000> : vector<2x8xf32>
    %72 = vector.multi_reduction <maximumf>, %71, %cst_60 [2] : vector<2x8x8xf32> to vector<2x8xf32>
    %73 = vector.shape_cast %72 : vector<2x8xf32> to vector<2x8x1xf32>
    %74 = vector.broadcast %73 : vector<2x8x1xf32> to vector<2x8x8xf32>
    %75 = arith.subf %71, %74 : vector<2x8x8xf32>
    %76 = math.exp %75 : vector<2x8x8xf32>
    %cst_61 = arith.constant dense<0.000000e+00> : vector<2x8xf32>
    %77 = vector.multi_reduction <add>, %76, %cst_61 [2] : vector<2x8x8xf32> to vector<2x8xf32>
    %78 = vector.shape_cast %77 : vector<2x8xf32> to vector<2x8x1xf32>
    "tpu.trace_start"() <{level = 10 : i32, message = "bqk,bkd->bqd"}> : () -> ()
    %cst_62 = arith.constant dense<0.000000e+00> : vector<2x8x16xf32>
    %79 = tpu.matmul %76, %70, %cst_62 {dimension_numbers = #tpu.dot_dimension_numbers<[2], [1], [1], [2], [0, 0, 0, 1, 1, 2], [0], [0]>} : vector<2x8x8xf32>, vector<2x8x16xf32>, vector<2x8x16xf32> -> vector<2x8x16xf32>
    "tpu.trace_stop"() : () -> ()
    %80 = tpu.reciprocal %78 {approx = true} : vector<2x8x1xf32> -> vector<2x8x1xf32>
    %81 = vector.broadcast %80 : vector<2x8x1xf32> to vector<2x8x16xf32>
    %82 = arith.mulf %79, %81 : vector<2x8x16xf32>
    %83 = vector.shape_cast %82 : vector<2x8x16xf32> to vector<16x16xf32>
    %84 = vector.extract_strided_slice %9 {offsets = [0, 0], sizes = [16, 32], strides = [1, 1]} : vector<32x32xf32> to vector<16x32xf32>
    %cst_63 = arith.constant dense<0.000000e+00> : vector<16x32xf32>
    %85 = tpu.matmul %83, %84, %cst_63 {dimension_numbers = #tpu.dot_dimension_numbers<[1], [0], [0], [1], [0, 0, 1, 1], [], []>} : vector<16x16xf32>, vector<16x32xf32>, vector<16x32xf32> -> vector<16x32xf32>
    %86 = arith.addf %62, %85 : vector<16x32xf32>
    %87 = vector.extract_strided_slice %59 {offsets = [0, 16], sizes = [16, 16], strides = [1, 1]} : vector<16x32xf32> to vector<16x16xf32>
    %cst_64 = arith.constant 2.500000e-01 : f32
    %88 = vector.broadcast %cst_64 : f32 to vector<16x16xf32>
    %89 = arith.mulf %87, %88 : vector<16x16xf32>
    %90 = vector.shape_cast %89 : vector<16x16xf32> to vector<2x8x16xf32>
    %91 = vector.extract_strided_slice %60 {offsets = [0, 16], sizes = [16, 16], strides = [1, 1]} : vector<16x32xf32> to vector<16x16xf32>
    %92 = vector.shape_cast %91 : vector<16x16xf32> to vector<2x8x16xf32>
    %93 = vector.extract_strided_slice %61 {offsets = [0, 16], sizes = [16, 16], strides = [1, 1]} : vector<16x32xf32> to vector<16x16xf32>
    %94 = vector.shape_cast %93 : vector<16x16xf32> to vector<2x8x16xf32>
    "tpu.trace_start"() <{level = 10 : i32, message = "bqd,bkd->bqk"}> : () -> ()
    %cst_65 = arith.constant dense<0.000000e+00> : vector<2x8x8xf32>
    %95 = tpu.matmul %90, %92, %cst_65 {dimension_numbers = #tpu.dot_dimension_numbers<[2], [2], [1], [1], [0, 0, 0, 1, 1, 1], [0], [0]>} : vector<2x8x16xf32>, vector<2x8x16xf32>, vector<2x8x8xf32> -> vector<2x8x8xf32>
    "tpu.trace_stop"() : () -> ()
    %cst_66 = arith.constant dense<0xFF800000> : vector<2x8xf32>
    %96 = vector.multi_reduction <maximumf>, %95, %cst_66 [2] : vector<2x8x8xf32> to vector<2x8xf32>
    %97 = vector.shape_cast %96 : vector<2x8xf32> to vector<2x8x1xf32>
    %98 = vector.broadcast %97 : vector<2x8x1xf32> to vector<2x8x8xf32>
    %99 = arith.subf %95, %98 : vector<2x8x8xf32>
    %100 = math.exp %99 : vector<2x8x8xf32>
    %cst_67 = arith.constant dense<0.000000e+00> : vector<2x8xf32>
    %101 = vector.multi_reduction <add>, %100, %cst_67 [2] : vector<2x8x8xf32> to vector<2x8xf32>
    %102 = vector.shape_cast %101 : vector<2x8xf32> to vector<2x8x1xf32>
    "tpu.trace_start"() <{level = 10 : i32, message = "bqk,bkd->bqd"}> : () -> ()
    %cst_68 = arith.constant dense<0.000000e+00> : vector<2x8x16xf32>
    %103 = tpu.matmul %100, %94, %cst_68 {dimension_numbers = #tpu.dot_dimension_numbers<[2], [1], [1], [2], [0, 0, 0, 1, 1, 2], [0], [0]>} : vector<2x8x8xf32>, vector<2x8x16xf32>, vector<2x8x16xf32> -> vector<2x8x16xf32>
    "tpu.trace_stop"() : () -> ()
    %104 = tpu.reciprocal %102 {approx = true} : vector<2x8x1xf32> -> vector<2x8x1xf32>
    %105 = vector.broadcast %104 : vector<2x8x1xf32> to vector<2x8x16xf32>
    %106 = arith.mulf %103, %105 : vector<2x8x16xf32>
    %107 = vector.shape_cast %106 : vector<2x8x16xf32> to vector<16x16xf32>
    %108 = vector.extract_strided_slice %9 {offsets = [16, 0], sizes = [16, 32], strides = [1, 1]} : vector<32x32xf32> to vector<16x32xf32>
    %cst_69 = arith.constant dense<0.000000e+00> : vector<16x32xf32>
    %109 = tpu.matmul %107, %108, %cst_69 {dimension_numbers = #tpu.dot_dimension_numbers<[1], [0], [0], [1], [0, 0, 1, 1], [], []>} : vector<16x16xf32>, vector<16x32xf32>, vector<16x32xf32> -> vector<16x32xf32>
    %110 = arith.addf %86, %109 : vector<16x32xf32>
    %111 = vector.extract_strided_slice %11 {offsets = [0, 0, 0], sizes = [1, 32, 96], strides = [1, 1, 1]} : vector<2x32x96xf32> to vector<1x32x96xf32>
    %112 = vector.shape_cast %111 : vector<1x32x96xf32> to vector<32x96xf32>
    %cst_70 = arith.constant dense<0.000000e+00> : vector<16x96xf32>
    %113 = tpu.matmul %110, %112, %cst_70 {dimension_numbers = #tpu.dot_dimension_numbers<[1], [0], [0], [1], [0, 0, 1, 1], [], []>} : vector<16x32xf32>, vector<32x96xf32>, vector<16x96xf32> -> vector<16x96xf32>
    %114 = vector.extract_strided_slice %13 {offsets = [0, 0, 0], sizes = [1, 1, 96], strides = [1, 1, 1]} : vector<2x1x96xf32> to vector<1x1x96xf32>
    %115 = vector.shape_cast %114 : vector<1x1x96xf32> to vector<1x96xf32>
    %116 = vector.broadcast %115 : vector<1x96xf32> to vector<16x96xf32>
    %117 = arith.addf %113, %116 : vector<16x96xf32>
    %118 = vector.extract_strided_slice %15 {offsets = [0, 0, 0], sizes = [1, 32, 64], strides = [1, 1, 1]} : vector<2x32x64xf32> to vector<1x32x64xf32>
    %119 = vector.shape_cast %118 : vector<1x32x64xf32> to vector<32x64xf32>
    %cst_71 = arith.constant dense<0.000000e+00> : vector<16x64xf32>
    %120 = tpu.matmul %3, %119, %cst_71 {dimension_numbers = #tpu.dot_dimension_numbers<[1], [0], [0], [1], [0, 0, 1, 1], [], []>} : vector<16x32xf32>, vector<32x64xf32>, vector<16x64xf32> -> vector<16x64xf32>
    %121 = vector.extract_strided_slice %17 {offsets = [0, 0, 0], sizes = [1, 1, 64], strides = [1, 1, 1]} : vector<2x1x64xf32> to vector<1x1x64xf32>
    %122 = vector.shape_cast %121 : vector<1x1x64xf32> to vector<1x64xf32>
    %123 = vector.broadcast %122 : vector<1x64xf32> to vector<16x64xf32>
    %124 = arith.addf %120, %123 : vector<16x64xf32>
    %125 = vector.extract_strided_slice %117 {offsets = [0, 0], sizes = [16, 32], strides = [1, 1]} : vector<16x96xf32> to vector<16x32xf32>
    %126 = vector.extract_strided_slice %124 {offsets = [0, 0], sizes = [16, 32], strides = [1, 1]} : vector<16x64xf32> to vector<16x32xf32>
    %127 = arith.addf %125, %126 : vector<16x32xf32>
    %128 = arith.negf %127 : vector<16x32xf32>
    %129 = math.exp %128 : vector<16x32xf32>
    %cst_72 = arith.constant 1.000000e+00 : f32
    %130 = vector.broadcast %cst_72 : f32 to vector<16x32xf32>
    %131 = arith.addf %130, %129 : vector<16x32xf32>
    %132 = arith.divf %130, %131 : vector<16x32xf32>
    %133 = vector.extract_strided_slice %117 {offsets = [0, 32], sizes = [16, 32], strides = [1, 1]} : vector<16x96xf32> to vector<16x32xf32>
    %134 = vector.extract_strided_slice %124 {offsets = [0, 32], sizes = [16, 32], strides = [1, 1]} : vector<16x64xf32> to vector<16x32xf32>
    %135 = arith.addf %133, %134 : vector<16x32xf32>
    %136 = vector.extract_strided_slice %23 {offsets = [0, 0, 0], sizes = [1, 1, 32], strides = [1, 1, 1]} : vector<2x1x32xf32> to vector<1x1x32xf32>
    %137 = vector.shape_cast %136 : vector<1x1x32xf32> to vector<1x32xf32>
    %138 = vector.broadcast %137 : vector<1x32xf32> to vector<16x32xf32>
    %139 = arith.subf %135, %138 : vector<16x32xf32>
    %140 = arith.negf %139 : vector<16x32xf32>
    %141 = math.exp %140 : vector<16x32xf32>
    %cst_73 = arith.constant 1.000000e+00 : f32
    %142 = vector.broadcast %cst_73 : f32 to vector<16x32xf32>
    %143 = arith.addf %142, %141 : vector<16x32xf32>
    %144 = arith.divf %142, %143 : vector<16x32xf32>
    %145 = vector.extract_strided_slice %117 {offsets = [0, 64], sizes = [16, 32], strides = [1, 1]} : vector<16x96xf32> to vector<16x32xf32>
    %146 = arith.mulf %132, %3 : vector<16x32xf32>
    %147 = vector.extract_strided_slice %19 {offsets = [0, 0, 0], sizes = [1, 32, 32], strides = [1, 1, 1]} : vector<2x32x32xf32> to vector<1x32x32xf32>
    %148 = vector.shape_cast %147 : vector<1x32x32xf32> to vector<32x32xf32>
    %cst_74 = arith.constant dense<0.000000e+00> : vector<16x32xf32>
    %149 = tpu.matmul %146, %148, %cst_74 {dimension_numbers = #tpu.dot_dimension_numbers<[1], [0], [0], [1], [0, 0, 1, 1], [], []>} : vector<16x32xf32>, vector<32x32xf32>, vector<16x32xf32> -> vector<16x32xf32>
    %150 = arith.addf %145, %149 : vector<16x32xf32>
    %151 = vector.extract_strided_slice %21 {offsets = [0, 0, 0], sizes = [1, 1, 32], strides = [1, 1, 1]} : vector<2x1x32xf32> to vector<1x1x32xf32>
    %152 = vector.shape_cast %151 : vector<1x1x32xf32> to vector<1x32xf32>
    %153 = vector.broadcast %152 : vector<1x32xf32> to vector<16x32xf32>
    %154 = arith.addf %150, %153 : vector<16x32xf32>
    %155 = math.tanh %154 : vector<16x32xf32>
    %cst_75 = arith.constant 1.000000e+00 : f32
    %156 = vector.broadcast %cst_75 : f32 to vector<16x32xf32>
    %157 = arith.subf %156, %144 : vector<16x32xf32>
    %158 = arith.mulf %157, %3 : vector<16x32xf32>
    %159 = arith.mulf %144, %155 : vector<16x32xf32>
    %160 = arith.addf %158, %159 : vector<16x32xf32>
    %161 = vector.extract_strided_slice %5 {offsets = [1, 0, 0], sizes = [1, 1, 32], strides = [1, 1, 1]} : vector<2x2x32xf32> to vector<1x1x32xf32>
    %162 = vector.shape_cast %161 : vector<1x1x32xf32> to vector<1x32xf32>
    %163 = vector.extract_strided_slice %5 {offsets = [1, 1, 0], sizes = [1, 1, 32], strides = [1, 1, 1]} : vector<2x2x32xf32> to vector<1x1x32xf32>
    %164 = vector.shape_cast %163 : vector<1x1x32xf32> to vector<1x32xf32>
    %cst_76 = arith.constant dense<0.000000e+00> : vector<16xf32>
    %165 = vector.multi_reduction <add>, %160, %cst_76 [1] : vector<16x32xf32> to vector<16xf32>
    %166 = vector.shape_cast %165 : vector<16xf32> to vector<16x1xf32>
    %cst_77 = arith.constant 3.200000e+01 : f32
    %167 = vector.broadcast %cst_77 : f32 to vector<16x1xf32>
    %168 = arith.divf %166, %167 : vector<16x1xf32>
    %169 = vector.broadcast %168 : vector<16x1xf32> to vector<16x32xf32>
    %170 = arith.subf %160, %169 : vector<16x32xf32>
    %171 = arith.mulf %170, %170 : vector<16x32xf32>
    %cst_78 = arith.constant dense<0.000000e+00> : vector<16xf32>
    %172 = vector.multi_reduction <add>, %171, %cst_78 [1] : vector<16x32xf32> to vector<16xf32>
    %173 = vector.shape_cast %172 : vector<16xf32> to vector<16x1xf32>
    %cst_79 = arith.constant 3.200000e+01 : f32
    %174 = vector.broadcast %cst_79 : f32 to vector<16x1xf32>
    %175 = arith.divf %173, %174 : vector<16x1xf32>
    %176 = vector.broadcast %168 : vector<16x1xf32> to vector<16x32xf32>
    %177 = arith.subf %160, %176 : vector<16x32xf32>
    %cst_80 = arith.constant 9.99999997E-7 : f32
    %178 = vector.broadcast %cst_80 : f32 to vector<16x1xf32>
    %179 = arith.addf %175, %178 : vector<16x1xf32>
    %180 = math.rsqrt %179 : vector<16x1xf32>
    %181 = vector.broadcast %180 : vector<16x1xf32> to vector<16x32xf32>
    %182 = arith.mulf %177, %181 : vector<16x32xf32>
    %183 = vector.broadcast %162 : vector<1x32xf32> to vector<16x32xf32>
    %184 = arith.mulf %182, %183 : vector<16x32xf32>
    %185 = vector.broadcast %164 : vector<1x32xf32> to vector<16x32xf32>
    %186 = arith.addf %184, %185 : vector<16x32xf32>
    %cst_81 = arith.constant dense<0.000000e+00> : vector<16x64xf32>
    %187 = tpu.matmul %186, %25, %cst_81 {dimension_numbers = #tpu.dot_dimension_numbers<[1], [0], [0], [1], [0, 0, 1, 1], [], []>} : vector<16x32xf32>, vector<32x64xf32>, vector<16x64xf32> -> vector<16x64xf32>
    %188 = vector.broadcast %27 : vector<1x64xf32> to vector<16x64xf32>
    %189 = arith.addf %187, %188 : vector<16x64xf32>
    %cst_82 = arith.constant 0.000000e+00 : f32
    %190 = vector.broadcast %cst_82 : f32 to vector<16x64xf32>
    %191 = arith.maximumf %189, %190 : vector<16x64xf32>
    %cst_83 = arith.constant dense<0.000000e+00> : vector<16x32xf32>
    %192 = tpu.matmul %191, %29, %cst_83 {dimension_numbers = #tpu.dot_dimension_numbers<[1], [0], [0], [1], [0, 0, 1, 1], [], []>} : vector<16x64xf32>, vector<64x32xf32>, vector<16x32xf32> -> vector<16x32xf32>
    %193 = vector.broadcast %31 : vector<1x32xf32> to vector<16x32xf32>
    %194 = arith.addf %192, %193 : vector<16x32xf32>
    %195 = vector.extract_strided_slice %11 {offsets = [1, 0, 0], sizes = [1, 32, 96], strides = [1, 1, 1]} : vector<2x32x96xf32> to vector<1x32x96xf32>
    %196 = vector.shape_cast %195 : vector<1x32x96xf32> to vector<32x96xf32>
    %cst_84 = arith.constant dense<0.000000e+00> : vector<16x96xf32>
    %197 = tpu.matmul %194, %196, %cst_84 {dimension_numbers = #tpu.dot_dimension_numbers<[1], [0], [0], [1], [0, 0, 1, 1], [], []>} : vector<16x32xf32>, vector<32x96xf32>, vector<16x96xf32> -> vector<16x96xf32>
    %198 = vector.extract_strided_slice %13 {offsets = [1, 0, 0], sizes = [1, 1, 96], strides = [1, 1, 1]} : vector<2x1x96xf32> to vector<1x1x96xf32>
    %199 = vector.shape_cast %198 : vector<1x1x96xf32> to vector<1x96xf32>
    %200 = vector.broadcast %199 : vector<1x96xf32> to vector<16x96xf32>
    %201 = arith.addf %197, %200 : vector<16x96xf32>
    %202 = vector.extract_strided_slice %15 {offsets = [1, 0, 0], sizes = [1, 32, 64], strides = [1, 1, 1]} : vector<2x32x64xf32> to vector<1x32x64xf32>
    %203 = vector.shape_cast %202 : vector<1x32x64xf32> to vector<32x64xf32>
    %cst_85 = arith.constant dense<0.000000e+00> : vector<16x64xf32>
    %204 = tpu.matmul %160, %203, %cst_85 {dimension_numbers = #tpu.dot_dimension_numbers<[1], [0], [0], [1], [0, 0, 1, 1], [], []>} : vector<16x32xf32>, vector<32x64xf32>, vector<16x64xf32> -> vector<16x64xf32>
    %205 = vector.extract_strided_slice %17 {offsets = [1, 0, 0], sizes = [1, 1, 64], strides = [1, 1, 1]} : vector<2x1x64xf32> to vector<1x1x64xf32>
    %206 = vector.shape_cast %205 : vector<1x1x64xf32> to vector<1x64xf32>
    %207 = vector.broadcast %206 : vector<1x64xf32> to vector<16x64xf32>
    %208 = arith.addf %204, %207 : vector<16x64xf32>
    %209 = vector.extract_strided_slice %201 {offsets = [0, 0], sizes = [16, 32], strides = [1, 1]} : vector<16x96xf32> to vector<16x32xf32>
    %210 = vector.extract_strided_slice %208 {offsets = [0, 0], sizes = [16, 32], strides = [1, 1]} : vector<16x64xf32> to vector<16x32xf32>
    %211 = arith.addf %209, %210 : vector<16x32xf32>
    %212 = arith.negf %211 : vector<16x32xf32>
    %213 = math.exp %212 : vector<16x32xf32>
    %cst_86 = arith.constant 1.000000e+00 : f32
    %214 = vector.broadcast %cst_86 : f32 to vector<16x32xf32>
    %215 = arith.addf %214, %213 : vector<16x32xf32>
    %216 = arith.divf %214, %215 : vector<16x32xf32>
    %217 = vector.extract_strided_slice %201 {offsets = [0, 32], sizes = [16, 32], strides = [1, 1]} : vector<16x96xf32> to vector<16x32xf32>
    %218 = vector.extract_strided_slice %208 {offsets = [0, 32], sizes = [16, 32], strides = [1, 1]} : vector<16x64xf32> to vector<16x32xf32>
    %219 = arith.addf %217, %218 : vector<16x32xf32>
    %220 = vector.extract_strided_slice %23 {offsets = [1, 0, 0], sizes = [1, 1, 32], strides = [1, 1, 1]} : vector<2x1x32xf32> to vector<1x1x32xf32>
    %221 = vector.shape_cast %220 : vector<1x1x32xf32> to vector<1x32xf32>
    %222 = vector.broadcast %221 : vector<1x32xf32> to vector<16x32xf32>
    %223 = arith.subf %219, %222 : vector<16x32xf32>
    %224 = arith.negf %223 : vector<16x32xf32>
    %225 = math.exp %224 : vector<16x32xf32>
    %cst_87 = arith.constant 1.000000e+00 : f32
    %226 = vector.broadcast %cst_87 : f32 to vector<16x32xf32>
    %227 = arith.addf %226, %225 : vector<16x32xf32>
    %228 = arith.divf %226, %227 : vector<16x32xf32>
    %229 = vector.extract_strided_slice %201 {offsets = [0, 64], sizes = [16, 32], strides = [1, 1]} : vector<16x96xf32> to vector<16x32xf32>
    %230 = arith.mulf %216, %160 : vector<16x32xf32>
    %231 = vector.extract_strided_slice %19 {offsets = [1, 0, 0], sizes = [1, 32, 32], strides = [1, 1, 1]} : vector<2x32x32xf32> to vector<1x32x32xf32>
    %232 = vector.shape_cast %231 : vector<1x32x32xf32> to vector<32x32xf32>
    %cst_88 = arith.constant dense<0.000000e+00> : vector<16x32xf32>
    %233 = tpu.matmul %230, %232, %cst_88 {dimension_numbers = #tpu.dot_dimension_numbers<[1], [0], [0], [1], [0, 0, 1, 1], [], []>} : vector<16x32xf32>, vector<32x32xf32>, vector<16x32xf32> -> vector<16x32xf32>
    %234 = arith.addf %229, %233 : vector<16x32xf32>
    %235 = vector.extract_strided_slice %21 {offsets = [1, 0, 0], sizes = [1, 1, 32], strides = [1, 1, 1]} : vector<2x1x32xf32> to vector<1x1x32xf32>
    %236 = vector.shape_cast %235 : vector<1x1x32xf32> to vector<1x32xf32>
    %237 = vector.broadcast %236 : vector<1x32xf32> to vector<16x32xf32>
    %238 = arith.addf %234, %237 : vector<16x32xf32>
    %239 = math.tanh %238 : vector<16x32xf32>
    %cst_89 = arith.constant 1.000000e+00 : f32
    %240 = vector.broadcast %cst_89 : f32 to vector<16x32xf32>
    %241 = arith.subf %240, %228 : vector<16x32xf32>
    %242 = arith.mulf %241, %160 : vector<16x32xf32>
    %243 = arith.mulf %228, %239 : vector<16x32xf32>
    %244 = arith.addf %242, %243 : vector<16x32xf32>
    %c0_90 = arith.constant 0 : index
    %c0_91 = arith.constant 0 : index
    %245 = vector.load %arg18[%c0_90, %c0_91] : memref<16x32xf32, #tpu.memory_space<vmem>>, vector<16x32xf32>
    tpu.vector_store %arg18[%c0_90, %c0_91], %244 {strides = array<i32>} : memref<16x32xf32, #tpu.memory_space<vmem>>, vector<16x32xf32>,
    %c1_i32 = arith.constant 1 : i32
    %246 = arith.cmpi eq, %arg1, %c1_i32 : i32
    %247 = arith.extui %246 : i1 to i32
    %c0_i32_92 = arith.constant 0 : i32
    %248 = arith.cmpi ne, %247, %c0_i32_92 : i32
    scf.if %248 {
      %249 = vector.shape_cast %244 : vector<16x32xf32> to vector<2x8x32xf32>
      %c0_93 = arith.constant 0 : index
      %c0_94 = arith.constant 0 : index
      %c0_95 = arith.constant 0 : index
      %250 = vector.load %arg17[%c0_93, %c0_94, %c0_95] : memref<2x8x32xf32, #tpu.memory_space<vmem>>, vector<2x8x32xf32>
      tpu.vector_store %arg17[%c0_93, %c0_94, %c0_95], %249 {strides = array<i32>} : memref<2x8x32xf32, #tpu.memory_space<vmem>>, vector<2x8x32xf32>,
    } else {
    }
    return
  }
  func.func @transform_0(%arg0: i32, %arg1: i32) -> (i32, i32, i32) {
    %c0_i32 = arith.constant 0 : i32
    %c0_i32_0 = arith.constant 0 : i32
    %c0_i32_1 = arith.constant 0 : i32
    return %arg0, %c0_i32, %c0_i32_0 : i32, i32, i32
  }
  func.func @transform_1(%arg0: i32, %arg1: i32) -> (i32, i32, i32, i32) {
    %c0_i32 = arith.constant 0 : i32
    %c0_i32_0 = arith.constant 0 : i32
    %c0_i32_1 = arith.constant 0 : i32
    %c0_i32_2 = arith.constant 0 : i32
    return %arg1, %c0_i32, %c0_i32_0, %c0_i32_1 : i32, i32, i32, i32
  }
  func.func @transform_2(%arg0: i32, %arg1: i32) -> (i32, i32, i32) {
    %c0_i32 = arith.constant 0 : i32
    %c0_i32_0 = arith.constant 0 : i32
    %c0_i32_1 = arith.constant 0 : i32
    return %arg1, %c0_i32, %c0_i32_0 : i32, i32, i32
  }
  func.func @transform_3(%arg0: i32, %arg1: i32) -> (i32, i32, i32) {
    %c0_i32 = arith.constant 0 : i32
    %c0_i32_0 = arith.constant 0 : i32
    %c0_i32_1 = arith.constant 0 : i32
    return %arg1, %c0_i32, %c0_i32_0 : i32, i32, i32
  }
  func.func @transform_4(%arg0: i32, %arg1: i32) -> (i32, i32, i32, i32) {
    %c0_i32 = arith.constant 0 : i32
    %c0_i32_0 = arith.constant 0 : i32
    %c0_i32_1 = arith.constant 0 : i32
    %c0_i32_2 = arith.constant 0 : i32
    return %arg1, %c0_i32, %c0_i32_0, %c0_i32_1 : i32, i32, i32, i32
  }
  func.func @transform_5(%arg0: i32, %arg1: i32) -> (i32, i32, i32, i32) {
    %c0_i32 = arith.constant 0 : i32
    %c0_i32_0 = arith.constant 0 : i32
    %c0_i32_1 = arith.constant 0 : i32
    %c0_i32_2 = arith.constant 0 : i32
    return %arg1, %c0_i32, %c0_i32_0, %c0_i32_1 : i32, i32, i32, i32
  }
  func.func @transform_6(%arg0: i32, %arg1: i32) -> (i32, i32, i32, i32) {
    %c0_i32 = arith.constant 0 : i32
    %c0_i32_0 = arith.constant 0 : i32
    %c0_i32_1 = arith.constant 0 : i32
    %c0_i32_2 = arith.constant 0 : i32
    return %arg1, %c0_i32, %c0_i32_0, %c0_i32_1 : i32, i32, i32, i32
  }
  func.func @transform_7(%arg0: i32, %arg1: i32) -> (i32, i32, i32, i32) {
    %c0_i32 = arith.constant 0 : i32
    %c0_i32_0 = arith.constant 0 : i32
    %c0_i32_1 = arith.constant 0 : i32
    %c0_i32_2 = arith.constant 0 : i32
    return %arg1, %c0_i32, %c0_i32_0, %c0_i32_1 : i32, i32, i32, i32
  }
  func.func @transform_8(%arg0: i32, %arg1: i32) -> (i32, i32, i32, i32) {
    %c0_i32 = arith.constant 0 : i32
    %c0_i32_0 = arith.constant 0 : i32
    %c0_i32_1 = arith.constant 0 : i32
    %c0_i32_2 = arith.constant 0 : i32
    return %arg1, %c0_i32, %c0_i32_0, %c0_i32_1 : i32, i32, i32, i32
  }
  func.func @transform_9(%arg0: i32, %arg1: i32) -> (i32, i32, i32, i32) {
    %c0_i32 = arith.constant 0 : i32
    %c0_i32_0 = arith.constant 0 : i32
    %c0_i32_1 = arith.constant 0 : i32
    %c0_i32_2 = arith.constant 0 : i32
    return %arg1, %c0_i32, %c0_i32_0, %c0_i32_1 : i32, i32, i32, i32
  }
  func.func @transform_10(%arg0: i32, %arg1: i32) -> (i32, i32, i32, i32) {
    %c0_i32 = arith.constant 0 : i32
    %c0_i32_0 = arith.constant 0 : i32
    %c0_i32_1 = arith.constant 0 : i32
    %c0_i32_2 = arith.constant 0 : i32
    return %arg1, %c0_i32, %c0_i32_0, %c0_i32_1 : i32, i32, i32, i32
  }
  func.func @transform_11(%arg0: i32, %arg1: i32) -> (i32, i32, i32) {
    %c0_i32 = arith.constant 0 : i32
    %c0_i32_0 = arith.constant 0 : i32
    %c0_i32_1 = arith.constant 0 : i32
    return %arg1, %c0_i32, %c0_i32_0 : i32, i32, i32
  }
  func.func @transform_12(%arg0: i32, %arg1: i32) -> (i32, i32, i32) {
    %c0_i32 = arith.constant 0 : i32
    %c0_i32_0 = arith.constant 0 : i32
    %c0_i32_1 = arith.constant 0 : i32
    return %arg1, %c0_i32, %c0_i32_0 : i32, i32, i32
  }
  func.func @transform_13(%arg0: i32, %arg1: i32) -> (i32, i32, i32) {
    %c0_i32 = arith.constant 0 : i32
    %c0_i32_0 = arith.constant 0 : i32
    %c0_i32_1 = arith.constant 0 : i32
    return %arg1, %c0_i32, %c0_i32_0 : i32, i32, i32
  }
  func.func @transform_14(%arg0: i32, %arg1: i32) -> (i32, i32, i32) {
    %c0_i32 = arith.constant 0 : i32
    %c0_i32_0 = arith.constant 0 : i32
    %c0_i32_1 = arith.constant 0 : i32
    return %arg1, %c0_i32, %c0_i32_0 : i32, i32, i32
  }
  func.func @transform_15(%arg0: i32, %arg1: i32) -> (i32, i32, i32) {
    %c0_i32 = arith.constant 0 : i32
    %c0_i32_0 = arith.constant 0 : i32
    %c0_i32_1 = arith.constant 0 : i32
    return %arg0, %c0_i32, %c0_i32_0 : i32, i32, i32
  }
}

</mosaic_0001>

<bundles_post_ra>
// kernel: tpu_custom_call.1
= control target key start
LH: loop header
LB: loop body
LE: loop exit
PB: predicated region body
PF: predicated region fallthrough
CT: control target
= control target key end

     0   :  { %s4601_s0 = inlined_call_operand.hbm [shape: f32[2,8,32], index: 0, kind: input, shape index: {}]   ;;  %s4602_s1 = inlined_call_operand.vmem [shape: f32[2,2,2,32], index: 1, kind: input, shape index: {}]   ;;  %s4603_s2 = inlined_call_operand.vmem [shape: f32[2,32,96], index: 2, kind: input, shape index: {}]   ;;  %s4604_s3 = inlined_call_operand.hbm [shape: f32[2,32,32], index: 3, kind: input, shape index: {}]   ;;  %s4605_s4 = inlined_call_operand.vmem [shape: f32[2,2,32,96], index: 4, kind: input, shape index: {}]   ;;  %s4606_s5 = inlined_call_operand.vmem [shape: f32[2,2,1,96], index: 5, kind: input, shape index: {}]   ;;  %s4607_s6 = inlined_call_operand.hbm [shape: f32[2,2,32,64], index: 6, kind: input, shape index: {}]   ;;  %s4608_s7 = inlined_call_operand.vmem [shape: f32[2,2,1,64], index: 7, kind: input, shape index: {}]   ;;  %s4609_s8 = inlined_call_operand.hbm [shape: f32[2,2,32,32], index: 8, kind: input, shape index: {}]   ;;  %s4610_s9 = inlined_call_operand.vmem [shape: f32[2,2,1,32], index: 9, kind: input, shape index: {}]   ;;  %s4611_s10 = inlined_call_operand.vmem [shape: f32[2,2,1,32], index: 10, kind: input, shape index: {}]   ;;  %s4612_s11 = inlined_call_operand.hbm [shape: f32[2,32,64], index: 11, kind: input, shape index: {}]   ;;  %s4613_s12 = inlined_call_operand.vmem [shape: f32[2,1,64], index: 12, kind: input, shape index: {}]   ;;  %s4614_s13 = inlined_call_operand.vmem [shape: f32[2,64,32], index: 13, kind: input, shape index: {}]   ;;  %s4615_s14 = inlined_call_operand.vmem [shape: f32[2,1,32], index: 14, kind: input, shape index: {}]   ;;  %s4616_s15 = inlined_call_operand.hbm [shape: f32[2,8,32], index: 15, kind: output, shape index: {}]  }
   0x1   :  { %4633 = sst [smem:[#allocation25_spill]] %s4601_s0 }
   0x2   :  { %4634 = sst [smem:[#allocation26_spill]] %s4602_s1 }
   0x3   :  { %4635 = sst [smem:[#allocation27_spill]] %s4603_s2 }
   0x4   :  { %4636 = sst [smem:[#allocation28_spill]] %s4604_s3 }
   0x5   :  { %4637 = sst [smem:[#allocation29_spill]] %s4605_s4 }
   0x6   :  { %4638 = sst [smem:[#allocation30_spill]] %s4606_s5 }
   0x7   :  { %4639 = sst [smem:[#allocation31_spill]] %s4607_s6 }
   0x8   :  { %4640 = sst [smem:[#allocation32_spill]] %s4608_s7 }
   0x9   :  { %4641 = sst [smem:[#allocation33_spill]] %s4609_s8 }
   0xa   :  { %4642 = sst [smem:[#allocation34_spill]] %s4610_s9 }
   0xb   :  { %4643 = sst [smem:[#allocation35_spill]] %s4611_s10 }
   0xc   :  { %4644 = sst [smem:[#allocation36_spill]] %s4612_s11 }
   0xd   :  { %4645 = sst [smem:[#allocation37_spill]] %s4613_s12 }
   0xe   :  { %4646 = sst [smem:[#allocation38_spill]] %s4614_s13 }
   0xf   :  { %4647 = sst [smem:[#allocation39_spill]] %s4615_s14 }
  0x10   :  { %4648 = sst [smem:[#allocation40_spill]] %s4616_s15 }
  0x11   :  { %20 = vsyncpa [#allocation4], 0 }
  0x12   :  { %21 = vsyncpa [#allocation7], 0 }
  0x13   :  { %23 = vsyncpa [#allocation7 + $0x1], 0 }
  0x14   :  { %24 = vsyncpa [#allocation10], 0 }
  0x15   :  { %26 = vsyncpa [#allocation10 + $0x1], 0 }
  0x16   :  { %27 = vsyncpa [#allocation5], 0  ;;  %s3969_s18 = smov 0   ;;  %s3971_s19 = smov 0  }
  0x17   :  { %s3973_s20 = smov 0   ;;  %s3975_s21 = smov 0  }
  0x18   :  { %s3977_s22 = smov 0   ;;  %s3979_s23 = smov 0  }
  0x19 LB: > { %4649 = sst [smem:[#allocation17_spill]] %s3853_s19  ;;  %s42_s24 = sadd.s32 1, %s3865_s22  ;;  %s3869_s23 = sphi %s3979_s23, %s33_s23   ;;  %s3865_s22 = sphi %s3977_s22, %s4700_s22   ;;  %s3861_s21 = sphi %s3975_s21, %s4699_s21   ;;  %s3857_s20 = sphi %s3973_s20, %s4698_s20   ;;  %s3853_s19 = sphi %s3971_s19, %s4697_s19   ;;  %s3849_s18 = sphi %s3969_s18, %s4696_s18  }
  0x1a   : > { %4650 = sst [smem:[#allocation18_spill]] %s3857_s20  ;;  %s130_s25 = sadd.s32 1, %s3857_s20 }
  0x1b   : > { %4651 = sst [smem:[#allocation19_spill]] %s3865_s22  ;;  %p43_p0 = scmp.ge.s32.totalorder %s42_s24, 2 }
  0x1c   : > { %4652 = sst [smem:[#allocation20_spill]] %s3869_s23  ;;  %p137_p1 = scmp.ne.s32.totalorder %s3857_s20, %s3853_s19 }
  0x1d   : > { %p138_p2 = scmp.eq.s32.totalorder %s3869_s23, 0  ;;  %s4702_s24 = smov (%p43_p0, %s42_s24), 0 }
  0x1e   : > { %4653 = sst [smem:[#allocation21_spill]] %s4702_s24  ;;  %s127_s27 = ssub.s32 %s3865_s22, %s4702_s24 }
  0x1f   : > { %p4006_p3 = por %p138_p2, %p137_p1  ;;  %p128_p4 = scmp.eq.s32.totalorder %s127_s27, 0 }
  0x20   : > { %p3503_p5 = scmp.lt.s32.totalorder %s3869_s23, 2  ;;  %s4618_s29 = sand.u32 1, %s3857_s20  }
  0x21   : > { %s4016_s30 = scalar_select %p128_p4, %s3857_s20, %s130_s25  }
  0x22   : > { %s4020_s16 = sshll.u32 %s4618_s29, 5  ;;  %s4620_s17 = sshll.u32 %s3865_s22, 9 }
  0x23   : > { %4655 = sst [smem:[#allocation22_spill]] %s4016_s30  ;;  %s4656_s3 = sld [smem:[#allocation28_spill]] }
  0x24   : > { %s515_s27 = scalar_lea.vmem [#allocation6], %s4020_s16  ;;  %p4035_p6 = pnand %p3503_p5, %p4006_p3 }
  0x25   : > { %s522_s28 = sshll.u32 %s515_s27, 4  ;;  %s4658_s29 = sand.u32 1, %s3869_s23   ;;  %s4031_s28 = int_to_ptr.vmem [resolvable:$true] %s522_s28 }
  0x26   : > { %s4041_s24 = scalar_lea.sflag [#allocation7], %s4658_s29  ;;  %p4047_p8 = pneg %p4035_p6 }
  0x29   : > { %s4028_s13 = scalar_lea.hbm %s4656_s3, %s4620_s17  ;;  %s3638_s17 = scalar_lea.hbm %s4656_s3, 1024 }
  0x2a   : > { %s3633_s14 = scalar_lea.hbm %s4028_s13, 512  ;;  %p3639_p11 = scmp.lt.u32.totalorder %s4028_s13, %s4656_s3 }
  0x2b   : > { %p3634_p7 = scmp.ne.s32.totalorder %s4028_s13, %s3633_s14  ;;  %p3640_p12 = scmp.lt.u32.totalorder %s3638_s17, %s3633_s14 }
  0x2c   : > { %p3642_p0 = scmp.lt.u32.totalorder %s3633_s14, %s4028_s13 }
  0x2d   : > { %p3636_p9 = pnand %p4047_p8, %p3634_p7  ;;  %p3641_p13 = por %p3640_p12, %p3639_p11 }
  0x2f   : > { %p3637_p10 = pneg %p3636_p9  ;;  %p3643_p1 = por %p3642_p0, %p3641_p13 }
  0x31   : > { %p3644_p2 = pnand %p3643_p1, %p3637_p10 }
  0x33   : > { %3647 = shalt.err (!%p3644_p2)
}
  0x34   : > { %s3648_s29 = scalar_lea.vmem %s4031_s28, 512  ;;  %s3871_s26 = smov [#allocation6]  }
  0x35   : > { %p3649_p3 = scmp.ne.s32.totalorder %s4031_s28, %s3648_s29  ;;  %s3653_s27 = sshll.u32 %s3871_s26, 4  ;;  %s3654_s27 = int_to_ptr.vmem [resolvable:$false] %s3653_s27 }
  0x36   : > { %s3655_s12 = scalar_lea.vmem %s3654_s27, 1024  ;;  %p3656_p7 = scmp.lt.s32.totalorder %s4031_s28, %s3654_s27 }
  0x37   : > { %p3651_p4 = pnand %p3649_p3, %p4047_p8  ;;  %p3657_p9 = scmp.lt.s32.totalorder %s3655_s12, %s3648_s29 }
  0x39   : > { %p3652_p5 = pneg %p3651_p4  ;;  %p3658_p11 = por %p3657_p9, %p3656_p7 }
  0x3b   : > { %p3659_p12 = pnand %p3658_p11, %p3652_p5 }
  0x3d   : > { %3662 = shalt.err (!%p3659_p12)
}
  0x3e   : > { %s3872_s30 = smov 128   ;;  %s3873_s17 = smov 8  }
  0x3f   : > { %3492 = dma.hbm_to_vmem [thread:$0]  (!%p4035_p6), %s4028_s13, 512, %s4031_s28, %s4041_s24, %s3872_s30, %s3872_s30, %s3873_s17  }
  0x40   : > { %s4660_s14 = sand.u32 1, %s3857_s20   ;;  %s3129_s26 = sshll.u32 %s3865_s22, 10 }
  0x41   : > { %s3043_s29 = sshll.u32 %s4660_s14, 6  ;;  %s614_s27 = scalar_lea.vmem [#allocation11], %s4020_s16 }
  0x42   : > { %s4078_s12 = sshll.u32 %s614_s27, 4  ;;  %s4661_s6 = sld [smem:[#allocation31_spill]]  ;;  %s4154_s12 = int_to_ptr.vmem [resolvable:$true] %s4078_s12 }
  0x43   : > { %s551_s7 = scalar_lea.vmem [#allocation8], %s3043_s29  ;;  %s4662_s8 = sld [smem:[#allocation33_spill]] }
  0x44   : > { %s4085_s5 = sshll.u32 %s551_s7, 4  ;;  %s579_s13 = scalar_lea.vmem [#allocation9], %s3043_s29  ;;  %s4138_s5 = int_to_ptr.vmem [resolvable:$true] %s4085_s5 }
  0x45   : > { %s586_s28 = sshll.u32 %s579_s13, 4  ;;  %s4663_s16 = sand.u32 1, %s3869_s23   ;;  %s4092_s28 = int_to_ptr.vmem [resolvable:$true] %s586_s28 }
  0x46   : > { %s4096_s3 = scalar_lea.sflag [#allocation10], %s4663_s16 }
  0x48   : > { %s4083_s9 = scalar_lea.hbm %s4661_s6, %s3129_s26 }
  0x49   : > { %s4090_s1 = scalar_lea.hbm %s4662_s8, %s3129_s26  ;;  %s3668_s4 = scalar_lea.hbm %s4662_s8, 2048 }
  0x4a   : > { %s3663_s10 = scalar_lea.hbm %s4090_s1, 1024  ;;  %p3669_p1 = scmp.lt.u32.totalorder %s4090_s1, %s4662_s8 }
  0x4b   : > { %p3664_p10 = scmp.ne.s32.totalorder %s4090_s1, %s3663_s10  ;;  %p3670_p2 = scmp.lt.u32.totalorder %s3668_s4, %s3663_s10 }
  0x4c   : > { %p3672_p4 = scmp.lt.u32.totalorder %s3663_s10, %s4090_s1 }
  0x4d   : > { %p3666_p13 = pnand %p3664_p10, %p4047_p8  ;;  %p3671_p3 = por %p3670_p2, %p3669_p1 }
  0x4f   : > { %p3667_p0 = pneg %p3666_p13  ;;  %p3673_p5 = por %p3672_p4, %p3671_p3 }
  0x51   : > { %p3674_p7 = pnand %p3673_p5, %p3667_p0 }
  0x53   : > { %3677 = shalt.err (!%p3674_p7)
}
  0x54   : > { %s3678_s29 = scalar_lea.vmem %s4092_s28, 1024  ;;  %s3874_s27 = smov [#allocation9]  }
  0x55   : > { %p3679_p9 = scmp.ne.s32.totalorder %s4092_s28, %s3678_s29  ;;  %s3683_s13 = sshll.u32 %s3874_s27, 4  ;;  %s3684_s13 = int_to_ptr.vmem [resolvable:$false] %s3683_s13 }
  0x56   : > { %s3685_s16 = scalar_lea.vmem %s3684_s13, 2048  ;;  %p3686_p10 = scmp.lt.s32.totalorder %s4092_s28, %s3684_s13 }
  0x57   : > { %p3681_p11 = pnand %p3679_p9, %p4047_p8  ;;  %p3687_p13 = scmp.lt.s32.totalorder %s3685_s16, %s3678_s29 }
  0x59   : > { %p3682_p12 = pneg %p3681_p11  ;;  %p3688_p1 = por %p3687_p13, %p3686_p10 }
  0x5b   : > { %p3689_p2 = pnand %p3688_p1, %p3682_p12 }
  0x5d   : > { %3692 = shalt.err (!%p3689_p2)
}
  0x5e   : > { %3498 = dma.hbm_to_vmem [thread:$0]  (!%p4035_p6), %s4090_s1, 1024, %s4092_s28, %s4096_s3, %s3872_s30, %s3872_s30, %s3873_s17  }
  0x5f   : > { %s4124_s10 = sadd.s32 4294967295, %s3869_s23   ;;  %p143_p0 = scmp.ne.s32.totalorder %s3853_s19, %s3849_s18 }
  0x60   : > { %4664 = sst [smem:[#allocation23_spill]] %s4124_s10  ;;  %p4621_p3 = scmp.eq.s32.totalorder %s4124_s10, 0 }
  0x61   : > { %p3037_p4 = scmp.ge.s32.totalorder %s3869_s23, 1  ;;  %p466_p5 = scmp.lt.s32.totalorder %s3869_s23, 3 }
  0x62   : > { %p4133_p7 = por %p4621_p3, %p143_p0  ;;  %s4667_s28 = sshll.u32 %s3865_s22, 9 }
  0x63   : > { %p4140_p9 = pnand %p3037_p4, %p466_p5  ;;  %s4668_s11 = sld [smem:[#allocation36_spill]] }
  0x64   : > { %s4665_s7 = scalar_select %p4133_p7, 1, 0 }
  0x65   : > { %s4666_s1 = scalar_select %p4140_p9, 1, 0 }
  0x66   : > { %s3875_s14 = smov [#allocation3]   ;;  %s3693_s29 = scalar_lea.hbm %s4083_s9, 1024 }
  0x67   : > { %s4151_s26 = sshll.u32 %s3875_s14, 4  ;;  %p3694_p12 = scmp.ne.s32.totalorder %s4083_s9, %s3693_s29  ;;  %s4184_s26 = int_to_ptr.vmem [resolvable:$true] %s4151_s26 }
  0x68   : > { %s3698_s16 = scalar_lea.hbm %s4661_s6, 2048  ;;  %p3699_p1 = scmp.lt.u32.totalorder %s4083_s9, %s4661_s6 }
  0x69   : > { %s4149_s18 = scalar_lea.hbm %s4668_s11, %s4667_s28  ;;  %p3696_p10 = pnand %p3694_p12, %p4047_p8 }
  0x6a   : > { %p3700_p2 = scmp.lt.u32.totalorder %s3698_s16, %s3693_s29  ;;  %p3702_p4 = scmp.lt.u32.totalorder %s3693_s29, %s4083_s9 }
  0x6b   : > { %p3697_p13 = pneg %p3696_p10 }
  0x6c   : > { %p3701_p0 = por %p3700_p2, %p3699_p1 }
  0x6e   : > { %p3703_p5 = por %p3702_p4, %p3701_p0 }
  0x70   : > { %p3704_p3 = pnand %p3703_p5, %p3697_p13 }
  0x72   : > { %3707 = shalt.err (!%p3704_p3)
}
  0x73   : > { %s3708_s28 = scalar_lea.vmem %s4138_s5, 1024  ;;  %s3876_s14 = smov [#allocation8]  }
  0x74   : > { %p3709_p12 = scmp.ne.s32.totalorder %s4138_s5, %s3708_s28  ;;  %s3713_s27 = sshll.u32 %s3876_s14, 4  ;;  %s3714_s27 = int_to_ptr.vmem [resolvable:$false] %s3713_s27 }
  0x75   : > { %s3715_s13 = scalar_lea.vmem %s3714_s27, 2048  ;;  %p3716_p7 = scmp.lt.s32.totalorder %s4138_s5, %s3714_s27 }
  0x76   : > { %p3711_p10 = pnand %p3709_p12, %p4047_p8  ;;  %p3717_p9 = scmp.lt.s32.totalorder %s3715_s13, %s3708_s28 }
  0x78   : > { %p3712_p11 = pneg %p3711_p10  ;;  %p3718_p1 = por %p3717_p9, %p3716_p7 }
  0x7a   : > { %p3719_p2 = pnand %p3718_p1, %p3712_p11 }
  0x7c   : > { %3722 = shalt.err (!%p3719_p2)
}
  0x7d   : > { %3495 = dma.hbm_to_vmem [thread:$0]  (!%p4035_p6), %s4083_s9, 1024, %s4138_s5, %s4041_s24, %s3872_s30, %s3872_s30, %s3873_s17  }
  0x7e   : > { %p4669_p3 = scmp.eq.s32.totalorder %s4124_s10, 0  ;;  %p4670_p7 = scmp.ne.s32.totalorder %s4666_s1, 0 }
  0x7f   : > { %s3723_s16 = scalar_lea.hbm %s4149_s18, 512  ;;  %s3728_s28 = scalar_lea.hbm %s4668_s11, 1024 }
  0x80   : > { %p4671_p9 = pneg %p4670_p7  ;;  %p3724_p13 = scmp.ne.s32.totalorder %s4149_s18, %s3723_s16 }
  0x81   : > { %p3729_p5 = scmp.lt.u32.totalorder %s4149_s18, %s4668_s11  ;;  %p3730_p12 = scmp.lt.u32.totalorder %s3728_s28, %s3723_s16 }
  0x82   : > { %p4191_p11 = pnand %p4671_p9, %p4669_p3  ;;  %p3726_p0 = pnand %p3724_p13, %p4047_p8 }
  0x83   : > { %p3731_p10 = por %p3730_p12, %p3729_p5  ;;  %p3732_p1 = scmp.lt.u32.totalorder %s3723_s16, %s4149_s18 }
  0x84   : > { %s4672_s29 = scalar_select %p4191_p11, 1, 0 }
  0x85   : > { %p3727_p4 = pneg %p3726_p0  ;;  %p3733_p2 = por %p3732_p1, %p3731_p10 }
  0x87   : > { %p3734_p3 = pnand %p3733_p2, %p3727_p4 }
  0x89   : > { %3737 = shalt.err (!%p3734_p3)
}
  0x8a   : > { %s3738_s9 = scalar_lea.vmem %s4154_s12, 512  ;;  %s3877_s24 = smov [#allocation11]  }
  0x8b   : > { %p3739_p9 = scmp.ne.s32.totalorder %s4154_s12, %s3738_s9  ;;  %s3743_s27 = sshll.u32 %s3877_s24, 4  ;;  %s3744_s27 = int_to_ptr.vmem [resolvable:$false] %s3743_s27 }
  0x8c   : > { %s3745_s13 = scalar_lea.vmem %s3744_s27, 1024  ;;  %p3746_p7 = scmp.lt.s32.totalorder %s4154_s12, %s3744_s27 }
  0x8d   : > { %p3741_p13 = pnand %p3739_p9, %p4047_p8  ;;  %p3747_p11 = scmp.lt.s32.totalorder %s3745_s13, %s3738_s9 }
  0x8f   : > { %p3742_p0 = pneg %p3741_p13  ;;  %p3748_p5 = por %p3747_p11, %p3746_p7 }
  0x91   : > { %p3749_p12 = pnand %p3748_p5, %p3742_p0 }
  0x93   : > { %3752 = shalt.err (!%p3749_p12)
}
  0x94   : > { %3501 = dma.hbm_to_vmem [thread:$0]  (!%p4035_p6), %s4149_s18, 512, %s4154_s12, %s4096_s3, %s3872_s30, %s3872_s30, %s3873_s17  }
  0x95   : > { %s4673_s0 = sld [smem:[#allocation25_spill]]  ;;  %p4674_p7 = scmp.ne.s32.totalorder %s4672_s29, 0 }
  0x97   : > { %p3755_p11 = pneg %p4674_p7 }
  0x9b   : > { %s3753_s2 = scalar_lea.hbm %s4673_s0, 256 }
  0x9c   : > { %p3754_p8 = scmp.ne.s32.totalorder %s4673_s0, %s3753_s2  ;;  %p3760_p1 = scmp.lt.u32.totalorder %s3753_s2, %s4673_s0 }
  0x9e   : > { %p3756_p4 = pnand %p3755_p11, %p3754_p8 }
  0xa0   : > { %p3757_p10 = pneg %p3756_p4 }
  0xa2   : > { %p3762_p2 = pnand %p3760_p1, %p3757_p10 }
  0xa4   : > { %3765 = shalt.err (!%p3762_p2)
}
  0xa5   : > { %s3766_s12 = scalar_lea.vmem %s4184_s26, 256  ;;  %p3774_p13 = scmp.lt.s32.totalorder %s4184_s26, %s4184_s26 }
  0xa6   : > { %p3767_p6 = scmp.ne.s32.totalorder %s4184_s26, %s3766_s12  ;;  %p3775_p0 = scmp.lt.s32.totalorder %s3766_s12, %s3766_s12 }
  0xa8   : > { %p3769_p3 = pnand %p3767_p6, %p3755_p11  ;;  %p3776_p5 = por %p3775_p0, %p3774_p13 }
  0xaa   : > { %p3770_p9 = pneg %p3769_p3 }
  0xac   : > { %p3777_p12 = pnand %p3776_p5, %p3770_p9 }
  0xae   : > { %3780 = shalt.err (!%p3777_p12)
}
  0xaf   : > { %3488 = dma.hbm_to_vmem [thread:$0]  (!%p4674_p7), %s4673_s0, 256, %s4184_s26, [#allocation4], %s3872_s30, %s3872_s30, %s3873_s17  }
  0xb0   : > { %p4675_p8 = scmp.ne.s32.totalorder %s4666_s1, 0 }
  0xb2   : > { %653 = sbr.rel (%p4675_p8) target bundleno = 4726 (0x1276), region = 80 }
  0xb9   : > { %p4676_p11 = scmp.eq.s32.totalorder %s4124_s10, 0 }
  0xbb   : > { %3832 = dma.done.wait (%p4676_p11), [#allocation4], 256   ;;  %p4677_p4 = pmov %p4676_p11 }
  0xbc   : > { %s659_s29 = sand.u32 1, %s4124_s10   ;;  %s661_s5 = sand.u32 1, %s3853_s19  }
  0xbd   : > { %3834 = vsyncadd (%p4677_p4), [#allocation4], 4294967040  ;;  %s3054_s9 = sshll.u32 %s661_s5, 5  ;;  %s660_s24 = scalar_lea.sflag [#allocation7], %s659_s29 }
  0xbe   : > { %s4252_s27 = scalar_lea.vmem [#allocation6], %s3054_s9  ;;  %p4678_p10 = scmp.ne.s32.totalorder %s4665_s7, 0 }
  0xc0   : > { %3836 = dma.done.wait (%p4678_p10), %s660_s24, 1536  }
  0xc1   : > { %3838 = vsyncadd (%p4678_p10), %s660_s24, 4294965760  ;;  %s3055_s30 = sshll.u32 %s661_s5, 6  ;;  %s678_s1 = scalar_lea.sflag [#allocation10], %s659_s29 }
  0xc2   : > { %s4258_s17 = scalar_lea.vmem [#allocation8], %s3055_s30  ;;  %s4260_s26 = scalar_lea.vmem [#allocation9], %s3055_s30 }
  0xc3   : > { %3840 = dma.done.wait (%p4678_p10), %s678_s1, 1536  }
  0xc4   : > { %3842 = vsyncadd (%p4678_p10), %s678_s1, 4294965760  ;;  %p790_p7 = scmp.lt.s32.totalorder %s3861_s21, 1  ;;  %s4679_s28 = sld [smem:[#allocation26_spill]] }
  0xc5   : > { %s4680_s12 = sld [smem:[#allocation27_spill]]  ;;  %s4681_s30 = sld [smem:[#allocation29_spill]] }
  0xc6   : > { %s4268_s13 = scalar_select %p790_p7, %s3861_s21, 1 }
  0xc7   : > { %s4682_s8 = sld [smem:[#allocation30_spill]]  ;;  %s4684_s4 = sld [smem:[#allocation32_spill]] }
  0xc8   : > { %s3132_s15 = sshll.u32 %s4268_s13, 2  ;;  %s3133_s16 = sshll.u32 %s4268_s13, 5 }
  0xc9   : > { %s3134_s18 = sshll.u32 %s4268_s13, 6  ;;  %s3064_s29 = sshll.u32 %s4268_s13, 1 }
  0xca   : > { %s4275_s25 = scalar_lea.vmem %s4679_s28, %s3132_s15  ;;  %s4685_s14 = sld [smem:[#allocation34_spill]] }
  0xcb   : > { %s4280_s3 = scalar_lea.vmem %s4680_s12, %s3133_s16  ;;  %s4287_s1 = scalar_lea.vmem %s4681_s30, %s3134_s18 }
  0xcc   : > { %s4686_s5 = sld [smem:[#allocation35_spill]]  ;;  %s4687_s0 = sld [smem:[#allocation37_spill]] }
  0xcd   : > { %s4292_s11 = scalar_lea.vmem %s4682_s8, %s3064_s29  ;;  %s4297_s28 = scalar_lea.vmem %s4684_s4, %s3064_s29 }
  0xce   : > { %4683 = sst [smem:[#allocation24_spill]] %s4292_s11  ;;  %s4688_s10 = sld [smem:[#allocation38_spill]] }
  0xcf   : > { %s4689_s11 = sld [smem:[#allocation39_spill]]  ;;  %s4322_s16 = scalar_lea.vmem [#allocation11], %s3054_s9 }
  0xd0   : > { %s4302_s12 = scalar_lea.vmem %s4685_s14, %s3064_s29  ;;  %p3070_p1 = scmp.ne.s32.totalorder %s3861_s21, 0 }
  0xd1   : > { %v837_v0 = vld [vmem:[#allocation3] sm:$0xff] (!%p3070_p1)  ;;  %vm839_vm0 = vcmask (!%p3070_p1), 261120   ;;  %v838_v1 = vld [vmem:[#allocation3 + $0x8] sm:$0xff] (!%p3070_p1) }
  0xd2   : > { %s4307_s24 = scalar_lea.vmem %s4686_s5, %s3064_s29  ;;  %s823_s6 = scalar_lea.vmem %s4687_s0, %s4268_s13  ;;  %840 = vst.msk [vmem:[#allocation2] sm:$0xff] (!%p3070_p1), %vm839_vm0, %v837_v0  ;;  %841 = vst.msk [vmem:[#allocation2 + $0x8] sm:$0xff] (!%p3070_p1), %vm839_vm0, %v838_v1 }
  0xd3   : > { %836 = sbr.rel (%p3070_p1) target bundleno = 218 (0xda), region = 104 }
  0xd4   : > { %s4316_s2 = scalar_lea.vmem %s4688_s10, %s3134_s18 }
  0xd5   : > { %s831_s7 = scalar_lea.vmem %s4689_s11, %s4268_s13 }
  0xda PF: > { %v4325_v2 = vld [vmem:[#allocation2] sm:$0xff]  ;;  %vm900_vm1 = vcmask 261120   ;;  %v4327_v3 = vld [vmem:[#allocation2 + $0x8] sm:$0xff]  ;;  %v848_v18 = vld [vmem:[%s4280_s3 + $0x10] sm:$0xff]  ;;  %v928_v24 = vlaneseq  ;;  %v3878_v43 = vmov 0.0   ;;  %vm3879_vm2 = vmmov 0  }
  0xdb   : > { %v901_v4 = vsel %vm900_vm1, %v4325_v2, 0.0  ;;  %v904_v5 = vsel %vm900_vm1, %v4327_v3, 0.0  ;;  %v846_v16 = vld [vmem:[%s4280_s3] sm:$0xff]  ;;  %v847_v17 = vld [vmem:[%s4280_s3 + $0x8] sm:$0xff]  ;;  %v849_v20 = vld [vmem:[%s4280_s3 + $0x18] sm:$0xff]  ;;  %3229 = vmatprep.subr.mxu1 %v3878_v43  ;;  %3231 = vmatprep.mubr.msk.f32.mxu1 %vm3879_vm2, %v3878_v43  ;;  %s3880_s11 = smov 96  }
  0xdc   : > { %902 = vadd.xlane.f32.xlu0 %v901_v4  ;;  %v3379_v19 = vpack.c.bf16 %v847_v17, %v846_v16  ;;  %v3383_v21 = vpack.c.bf16 %v849_v20, %v848_v18  ;;  %v4341_v28 = vshrl.u32 %v928_v24, 7  ;;  %v844_v31 = vld [vmem:[%s4275_s25] sm:$0x3]  ;;  %vm1026_vm3 = vcmask 130048   ;;  %s3881_s19 = smov 64   ;;  %s3882_s20 = smov 80  }
  0xdd   : > { %vm1180_vm4 = vcmask 64512   ;;  %s3883_s22 = smov 112   ;;  %s3884_s23 = smov 48   ;;  %vm2345_vm5 = vcmask 523264  }
  0xde   : > { %3380 = vmatprep.subr.bf16.mxu0 %v3379_v19  ;;  %v930_v30 = vsub.s32 0, %v4341_v28  ;;  %v936_v32 = vsub.s32 1, %v4341_v28  ;;  %s4690_s10 = sld [smem:[#allocation24_spill]]  ;;  %s3885_s9 = smov 32  }
  0xdf   : > { %3382 = vmatpush3.bf16.msra.mxu0 %v3379_v19  ;;  %p3123_p2 = scmp.ne.s32.totalorder %s3861_s21, 1 }
  0xe0   : > { %905 = vadd.xlane.f32.xlu0 %v904_v5  ;;  %3384 = vmatprep.subr.bf16.mxu0 %v3383_v21  ;;  %v931_v33 = vrot.slane %v844_v31, %v930_v30  ;;  %v937_v36 = vrot.slane %v844_v31, %v936_v32 }
  0xe3   : > { %3386 = vmatpush3.bf16.msra.mxu0 %v3383_v21 }
  0xe4   : > { %3239 = vmatprep.subr.mxu0 %v3878_v43 }
 0x169   : > { %v903_v6 = vpop.xlane.xlu0 %902 }
 0x16a   : > { %v908_v7 = vmul.f32 0.03125, %v903_v6 }
 0x16c   : > { %v910_v8 = vsub.f32 %v4325_v2, %v908_v7 }
 0x16d   : > { %v906_v9 = vpop.xlane.xlu0 %905 }
 0x16e   : > { %v909_v10 = vmul.f32 0.03125, %v906_v9  ;;  %v912_v11 = vmul.f32 %v910_v8, %v910_v8 }
 0x170   : > { %v911_v12 = vsub.f32 %v4327_v3, %v909_v10  ;;  %v914_v13 = vsel %vm900_vm1, %v912_v11, 0.0 }
 0x171   : > { %915 = vadd.xlane.f32.xlu1 %v914_v13 }
 0x172   : > { %v913_v14 = vmul.f32 %v911_v12, %v911_v12 }
 0x174   : > { %v917_v15 = vsel %vm900_vm1, %v913_v14, 0.0 }
 0x175   : > { %918 = vadd.xlane.f32.xlu1 %v917_v15 }
 0x1fe   : > { %v916_v22 = vpop.xlane.xlu1 %915 }
 0x1ff   : > { %v920_v23 = vmul.f32 0.03125, %v916_v22 }
 0x201   : > { %v922_v25 = vadd.f32 1e-06, %v920_v23 }
 0x202   : > { %v919_v26 = vpop.xlane.xlu1 %918 }
 0x203   : > { %3569 = vrsqrt.f32 %v922_v25  ;;  %v921_v27 = vmul.f32 0.03125, %v919_v26 }
 0x205   : > { %v923_v29 = vadd.f32 1e-06, %v921_v27 }
 0x207   : > { %3571 = vrsqrt.f32 %v923_v29 }
 0x20d   : > { %v3570_v34 = vpop.eup %3569 }
 0x20e   : > { %v926_v35 = vmul.f32 %v3570_v34, %v910_v8 }
 0x210   : > { %v932_v37 = vmul.f32 %v931_v33, %v926_v35  ;;  %v852_v35 = vld [vmem:[%s4252_s27 + $0x10] sm:$0xff] }
 0x211   : > { %v3572_v38 = vpop.eup %3571 }
 0x212   : > { %v927_v39 = vmul.f32 %v3572_v38, %v911_v12  ;;  %v938_v40 = vadd.f32 %v937_v36, %v932_v37  ;;  %v850_v38 = vld [vmem:[%s4252_s27] sm:$0xff] }
 0x214   : > { %v933_v41 = vmul.f32 %v931_v33, %v927_v39  ;;  %3226 = vmatprep.mubr.msk.f32.mxu0 %vm900_vm1, %v938_v40  ;;  %v851_v39 = vld [vmem:[%s4252_s27 + $0x8] sm:$0xff] }
 0x215   : > { %v3391_v40 = vpack.c.bf16 %v851_v39, %v850_v38 }
 0x216   : > { %v939_v42 = vadd.f32 %v937_v36, %v933_v41  ;;  %v853_v36 = vld [vmem:[%s4252_s27 + $0x18] sm:$0xff]  ;;  %v854_v41 = vld [vmem:[%s4287_s1] sm:$0xff] }
 0x217   : > { %v3387_v37 = vpack.c.bf16 %v853_v36, %v852_v35 }
 0x218   : > { %3227 = vmatmul.mubr.msk.f32.vlgmr.msra.gmra.mrb[0].mxu0 %vm900_vm1, %v939_v42  ;;  %v855_v42 = vld [vmem:[%s4287_s1 + $0x8] sm:$0xff] }
 0x219   : > { %3241 = vmatprep.mubr.msk.f32.mxu0 %vm3879_vm2, %v3878_v43 }
 0x2eb   : > { %v4358_v44 = vpop.f32.mrb[0].mxu0 }
 0x2ec   : > { %1103 = vrot.lane.b32.xlu1 %v4358_v44, %s3880_s11  ;;  %v4362_v45 = vpop.f32.mrb[1].mxu0  ;;  %v1022_v49 = vmul.f32 0.25, %v4358_v44 }
 0x2ed   : > { %1024 = vrot.lane.b32.xlu0 %v4362_v45, %s3880_s11  ;;  %v1021_v47 = vmul.f32 0.25, %v4362_v45 }
 0x35e   : > { %v1104_v48 = vpop.permute.xlu1 %1103 }
 0x35f   : > { %v1025_v46 = vpop.permute.xlu0 %1024 }
 0x360   : > { %3230 = vmatpush3.xpose.msk.msra.mxu1 %vm1026_vm3, %v1025_v46 }
 0x361   : > { %3234 = vmatprep.subr.mxu1 %v3878_v43 }
 0x363   : > { %3232 = vmatmul.mubr.msk.f32.vlgmr.msra.gmra.mrb[0].mxu1 %vm1026_vm3, %v1021_v47 }
 0x364   : > { %3235 = vmatpush3.xpose.msk.msra.mxu1 %vm1026_vm3, %v1104_v48  ;;  %3236 = vmatprep.mubr.msk.f32.mxu1 %vm3879_vm2, %v3878_v43 }
 0x365   : > { %3244 = vmatprep.subr.mxu1 %v3878_v43 }
 0x367   : > { %3237 = vmatmul.mubr.msk.f32.vlgmr.msra.gmra.mrb[2].mxu1 %vm1026_vm3, %v1022_v49 }
 0x368   : > { %3246 = vmatprep.mubr.msk.f32.mxu1 %vm3879_vm2, %v3878_v43 }
 0x436   : > { %v1098_v50 = vpop.f32.mrb[0].mxu1 }
 0x437   : > { %v3233_v51 = vpop.f32.mrb[1].mxu1  ;;  %v1181_v52 = vsel %vm1180_vm4, %v1098_v50, -inf }
 0x438   : > { %1182 = vmax.xlane.f32.xlu1 %v1181_v52 }
 0x43a   : > { %v1176_v53 = vpop.f32.mrb[2].mxu1 }
 0x43b   : > { %v3238_v54 = vpop.f32.mrb[3].mxu1  ;;  %v1184_v55 = vsel %vm1180_vm4, %v1176_v53, -inf }
 0x43c   : > { %1185 = vmax.xlane.f32.xlu0 %v1184_v55  ;;  %v864_v55 = vld [vmem:[%s4258_s17] sm:$0xff] }
 0x449   : > { %1275 = vrot.lane.b32.xlu1 %v4358_v44, %s3881_s19 }
 0x44d   : > { %1357 = vrot.lane.b32.xlu1 %v4362_v45, %s3882_s20 }
 0x451   : > { %1435 = vrot.lane.b32.xlu1 %v4358_v44, %s3882_s20 }
 0x452   : > { %1199 = vrot.lane.b32.xlu0 %v4362_v45, %s3881_s19 }
 0x455   : > { %1433 = vrot.lane.b32.xlu1 %v1022_v49, %s3883_s22 }
 0x456   : > { %1355 = vrot.lane.b32.xlu0 %v1021_v47, %s3883_s22 }
 0x4c5   : > { %v1183_v56 = vpop.xlane.xlu1 %1182 }
 0x4c6   : > { %v1187_v57 = vsub.f32 %v1098_v50, %v1183_v56  ;;  %v865_v56 = vld [vmem:[%s4258_s17 + $0x8] sm:$0xff] }
 0x4c8   : > { %v1189_v58 = vmul.f32 1.442695, %v1187_v57 }
 0x4c9   : > { %v1276_v59 = vpop.permute.xlu1 %1275  ;;  %v1186_v60 = vpop.xlane.xlu0 %1185 }
 0x4ca   : > { %3573 = vpow2.f32 %v1189_v58  ;;  %v1188_v61 = vsub.f32 %v1176_v53, %v1186_v60  ;;  %3245 = vmatpush3.msra.mxu1 %v1276_v59 }
 0x4cb   : > { %3254 = vmatprep.subr.mxu1 %v3878_v43 }
 0x4cc   : > { %v1191_v62 = vmul.f32 1.442695, %v1188_v61 }
 0x4cd   : > { %v1200_v63 = vpop.permute.xlu0 %1199  ;;  %v1358_v0 = vpop.permute.xlu1 %1357 }
 0x4ce   : > { %3575 = vpow2.f32 %v1191_v62  ;;  %3240 = vmatpush3.msra.mxu0 %v1200_v63  ;;  %v3403_v62 = vpack.c.bf16 %v865_v56, %v864_v55 }
 0x4cf   : > { %3249 = vmatprep.subr.mxu0 %v3878_v43 }
 0x4d1   : > { %v1436_v4 = vpop.permute.xlu1 %1435  ;;  %v1356_v6 = vpop.permute.xlu0 %1355 }
 0x4d4   : > { %v3574_v1 = vpop.eup %3573 }
 0x4d5   : > { %3242 = vmatmul.mubr.msk.f32.vlgmr.msra.gmra.mrb[2].mxu0 %vm1180_vm4, %v3574_v1  ;;  %v1434_v7 = vpop.permute.xlu1 %1433  ;;  %v1193_v31 = vsel %vm1180_vm4, %v3574_v1, 0.0  ;;  %v866_v1 = vld [vmem:[%s4258_s17 + $0x10] sm:$0xff] }
 0x4d6   : > { %3250 = vmatpush3.xpose.msk.msra.mxu0 %vm1026_vm3, %v1358_v0  ;;  %3251 = vmatprep.mubr.msk.f32.mxu0 %vm3879_vm2, %v3878_v43 }
 0x4d7   : > { %3259 = vmatprep.subr.mxu0 %v3878_v43 }
 0x4d8   : > { %v3576_v5 = vpop.eup %3575 }
 0x4d9   : > { %3247 = vmatmul.mubr.msk.f32.vlgmr.msra.gmra.mrb[4].mxu1 %vm1180_vm4, %v3576_v5  ;;  %3252 = vmatmul.mubr.msk.f32.vlgmr.msra.gmra.mrb[4].mxu0 %vm1026_vm3, %v1356_v6  ;;  %v1196_v34 = vsel %vm1180_vm4, %v3576_v5, 0.0 }
 0x4da   : > { %3255 = vmatpush3.xpose.msk.msra.mxu1 %vm1026_vm3, %v1436_v4  ;;  %3256 = vmatprep.mubr.msk.f32.mxu1 %vm3879_vm2, %v3878_v43  ;;  %v867_v4 = vld [vmem:[%s4258_s17 + $0x18] sm:$0xff] }
 0x4db   : > { %3264 = vmatprep.subr.mxu1 %v3878_v43  ;;  %3261 = vmatprep.mubr.msk.f32.mxu0 %vm3879_vm2, %v3878_v43  ;;  %v3407_v6 = vpack.c.bf16 %v867_v4, %v866_v1 }
 0x4dd   : > { %3257 = vmatmul.mubr.msk.f32.vlgmr.msra.gmra.mrb[6].mxu1 %vm1026_vm3, %v1434_v7 }
 0x4de   : > { %3266 = vmatprep.mubr.msk.f32.mxu1 %vm3879_vm2, %v3878_v43  ;;  %v3395_v43 = vpack.c.bf16 %v855_v42, %v854_v41  ;;  %v3102_v42 = vld [vmem:[%s4302_s12] ss:$0 sm:$0xff] }
 0x5a8   : > { %v4404_v8 = vpop.f32.mrb[2].mxu0 }
 0x5a9   : > { %v3243_v9 = vpop.f32.mrb[3].mxu0 }
 0x5ac   : > { %v4406_v10 = vpop.f32.mrb[4].mxu1  ;;  %v1429_v11 = vpop.f32.mrb[4].mxu0 }
 0x5ad   : > { %v3248_v12 = vpop.f32.mrb[5].mxu1  ;;  %v3253_v13 = vpop.f32.mrb[5].mxu0  ;;  %v1511_v14 = vsel %vm1180_vm4, %v1429_v11, -inf }
 0x5ae   : > { %1512 = vmax.xlane.f32.xlu0 %v1511_v14  ;;  %v875_v12 = vld [vmem:[%s4260_s26 + $0x8] sm:$0xff]  ;;  %v876_v13 = vld [vmem:[%s4260_s26 + $0x10] sm:$0xff] }
 0x5b0   : > { %v1507_v15 = vpop.f32.mrb[6].mxu1 }
 0x5b1   : > { %v3258_v16 = vpop.f32.mrb[7].mxu1  ;;  %v1514_v17 = vsel %vm1180_vm4, %v1507_v15, -inf }
 0x5b2   : > { %1515 = vmax.xlane.f32.xlu1 %v1514_v17  ;;  %v3092_v17 = vld [vmem:[%s4297_s28] ss:$0 sm:$0xff] }
 0x5c3   : > { %1605 = vrot.lane.b32.xlu1 %v4358_v44, %s3884_s23  ;;  %v856_v44 = vld [vmem:[%s4287_s1 + $0x10] sm:$0xff] }
 0x5c4   : > { %1529 = vrot.lane.b32.xlu0 %v4362_v45, %s3884_s23  ;;  %v857_v45 = vld [vmem:[%s4287_s1 + $0x18] sm:$0xff] }
 0x5c5   : > { %v3399_v46 = vpack.c.bf16 %v857_v45, %v856_v44 }
 0x63b   : > { %v1513_v18 = vpop.xlane.xlu0 %1512 }
 0x63c   : > { %v1517_v19 = vsub.f32 %v1429_v11, %v1513_v18  ;;  %v874_v11 = vld [vmem:[%s4260_s26] sm:$0xff] }
 0x63d   : > { %v3411_v14 = vpack.c.bf16 %v875_v12, %v874_v11  ;;  %v3089_v18 = vld [vmem:[%s4690_s10] ss:$0 sm:$0xff] }
 0x63e   : > { %v1519_v20 = vmul.f32 1.442695, %v1517_v19 }
 0x63f   : > { %v1530_v21 = vpop.permute.xlu0 %1529  ;;  %v1516_v22 = vpop.xlane.xlu1 %1515 }
 0x640   : > { %3577 = vpow2.f32 %v1519_v20  ;;  %v1518_v23 = vsub.f32 %v1507_v15, %v1516_v22  ;;  %3260 = vmatpush3.msra.mxu0 %v1530_v21  ;;  %v877_v15 = vld [vmem:[%s4260_s26 + $0x18] sm:$0xff] }
 0x641   : > { %3388 = vmatprep.subr.bf16.mxu0 %v3387_v37  ;;  %v3415_v16 = vpack.c.bf16 %v877_v15, %v876_v13 }
 0x642   : > { %v1521_v24 = vmul.f32 1.442695, %v1518_v23 }
 0x643   : > { %v1606_v25 = vpop.permute.xlu1 %1605 }
 0x644   : > { %3579 = vpow2.f32 %v1521_v24  ;;  %3265 = vmatpush3.msra.mxu1 %v1606_v25 }
 0x645   : > { %3396 = vmatprep.subr.bf16.mxu1 %v3395_v43 }
 0x64a   : > { %v3578_v26 = vpop.eup %3577 }
 0x64b   : > { %3262 = vmatmul.mubr.msk.f32.vlgmr.msra.gmra.mrb[6].mxu0 %vm1180_vm4, %v3578_v26  ;;  %v1523_v27 = vsel %vm1180_vm4, %v3578_v26, 0.0 }
 0x64c   : > { %1524 = vadd.xlane.f32.xlu0 %v1523_v27  ;;  %3390 = vmatpush3.bf16.msra.mxu0 %v3387_v37 }
 0x64d   : > { %3392 = vmatprep.subr.bf16.mxu0 %v3391_v40 }
 0x64e   : > { %v3580_v29 = vpop.eup %3579 }
 0x64f   : > { %3267 = vmatmul.mubr.msk.f32.vlgmr.msra.gmra.mrb[8].mxu1 %vm1180_vm4, %v3580_v29  ;;  %v1526_v33 = vsel %vm1180_vm4, %v3580_v29, 0.0 }
 0x650   : > { %1194 = vadd.xlane.f32.xlu0 %v1193_v31  ;;  %1527 = vadd.xlane.f32.xlu1 %v1526_v33 }
 0x651   : > { %3398 = vmatpush3.bf16.msra.mxu1 %v3395_v43  ;;  %v3097_v43 = vld [vmem:[%s4307_s24] ss:$0 sm:$0xff] }
 0x652   : > { %3400 = vmatprep.subr.bf16.mxu1 %v3399_v46 }
 0x654   : > { %1197 = vadd.xlane.f32.xlu0 %v1196_v34 }
 0x655   : > { %3402 = vmatpush3.bf16.msra.mxu1 %v3399_v46 }
 0x656   : > { %3412 = vmatprep.subr.bf16.mxu1 %v3411_v14 }
 0x6d9   : > { %v1525_v47 = vpop.xlane.xlu0 %1524 }
 0x6da   : > { %3581 = vrcp.f32 %v1525_v47 }
 0x6dd   : > { %v1195_v48 = vpop.xlane.xlu0 %1194  ;;  %v1528_v49 = vpop.xlane.xlu1 %1527 }
 0x6de   : > { %3583 = vrcp.f32 %v1195_v48 }
 0x6df   : > { %3585 = vrcp.f32 %v1528_v49 }
 0x6e1   : > { %v1198_v50 = vpop.xlane.xlu0 %1197 }
 0x6e2   : > { %3587 = vrcp.f32 %v1198_v50 }
 0x6e4   : > { %v3582_v51 = vpop.eup %3581 }
 0x6e8   : > { %v3584_v57 = vpop.eup %3583 }
 0x6e9   : > { %v3586_v58 = vpop.eup %3585  ;;  %v1353_v63 = vmul.f32 %v3584_v57, %v4404_v8 }
 0x6ec   : > { %v3588_v0 = vpop.eup %3587 }
 0x6ed   : > { %v1354_v5 = vmul.f32 %v3588_v0, %v4406_v10 }
 0x71e   : > { %v1601_v52 = vpop.f32.mrb[6].mxu0 }
 0x71f   : > { %v1683_v53 = vmul.f32 %v3582_v51, %v1601_v52  ;;  %v3263_v54 = vpop.f32.mrb[7].mxu0 }
 0x721   : > { %3273 = vmatprep.mubr.msk.f32.mxu0 %vm1026_vm3, %v1683_v53 }
 0x722   : > { %v1677_v59 = vpop.f32.mrb[8].mxu1 }
 0x723   : > { %v1684_v60 = vmul.f32 %v3586_v58, %v1677_v59  ;;  %v3268_v61 = vpop.f32.mrb[9].mxu1 }
 0x725   : > { %3274 = vmatmul.mubr.msk.f32.vlgmr.msra.gmra.mrb[8].mxu0 %vm1026_vm3, %v1684_v60 }
 0x726   : > { %3394 = vmatpush3.bf16.msra.mxu0 %v3391_v40  ;;  %3280 = vmatprep.mubr.msk.f32.mxu0 %vm1026_vm3, %v1353_v63 }
 0x727   : > { %3404 = vmatprep.subr.bf16.mxu0 %v3403_v62 }
 0x72d   : > { %3281 = vmatmul.mubr.msk.f32.vlgmr.msra.gmra.mrb[8].mxu0 %vm1026_vm3, %v1354_v5 }
 0x72e   : > { %3406 = vmatpush3.bf16.msra.mxu0 %v3403_v62  ;;  %3302 = vmatprep.mubr.msk.f32.mxu0 %vm900_vm1, %v4325_v2 }
 0x72f   : > { %3408 = vmatprep.subr.bf16.mxu0 %v3407_v6 }
 0x732   : > { %3410 = vmatpush3.bf16.msra.mxu0 %v3407_v6 }
 0x735   : > { %3303 = vmatmul.mubr.msk.f32.vlgmr.msra.gmra.mrb[10].mxu0 %vm900_vm1, %v4327_v3 }
 0x800   : > { %v3282_v7 = vpop.f32.mrb[8].mxu0 }
 0x801   : > { %v1838_v8 = vpop.f32.mrb[9].mxu0 }
 0x802   : > { %3291 = vmatprep.mubr.msk.f32.mxu1 %vm900_vm1, %v1838_v8 }
 0x803   : > { %3292 = vmatmul.mubr.msk.f32.vlgmr.msra.gmra.mrb[10].mxu1 %vm900_vm1, %v3282_v7 }
 0x804   : > { %3414 = vmatpush3.bf16.msra.mxu1 %v3411_v14 }
 0x805   : > { %3416 = vmatprep.subr.bf16.mxu1 %v3415_v16 }
 0x808   : > { %v3304_v9 = vpop.f32.mrb[10].mxu0  ;;  %3418 = vmatpush3.bf16.msra.mxu1 %v3415_v16 }
 0x809   : > { %v2012_v10 = vpop.f32.mrb[11].mxu0  ;;  %v2018_v19 = vadd.f32 %v3304_v9, %v3092_v17 }
 0x80a   : > { %v2013_v21 = vadd.f32 %v3092_v17, %v2012_v10 }
 0x8d6   : > { %v3293_v20 = vpop.f32.mrb[10].mxu1 }
 0x8d7   : > { %v1931_v22 = vadd.f32 %v3293_v20, %v3089_v18  ;;  %v1925_v23 = vpop.f32.mrb[11].mxu1 }
 0x8d8   : > { %v1926_v24 = vadd.f32 %v3089_v18, %v1925_v23 }
 0x8d9   : > { %v2022_v25 = vadd.f32 %v2018_v19, %v1931_v22 }
 0x8da   : > { %v2021_v26 = vadd.f32 %v2013_v21, %v1926_v24 }
 0x8db   : > { %v3096_v27 = vmul.f32 -1.442695, %v2022_v25 }
 0x8dc   : > { %v3095_v29 = vmul.f32 -1.442695, %v2021_v26 }
 0x8dd   : > { %3589 = vpow2.f32 %v3096_v27 }
 0x8de   : > { %3591 = vpow2.f32 %v3095_v29  ;;  %v845_v29 = vld [vmem:[%s4275_s25 + $0x2] sm:$0x3] }
 0x8e7   : > { %v3590_v31 = vpop.eup %3589 }
 0x8e8   : > { %v3592_v33 = vpop.eup %3591  ;;  %v2030_v34 = vadd.f32 1.0, %v3590_v31  ;;  %v2239_v31 = vrot.slane %v845_v29, %v936_v32 }
 0x8e9   : > { %v2029_v35 = vadd.f32 1.0, %v3592_v33  ;;  %v2229_v33 = vrot.slane %v845_v29, %v930_v30 }
 0x8ea   : > { %3593 = vrcp.f32 %v2030_v34  ;;  %v886_v34 = vld [vmem:[%s4322_s16] sm:$0xff] }
 0x8eb   : > { %3595 = vrcp.f32 %v2029_v35  ;;  %v887_v35 = vld [vmem:[%s4322_s16 + $0x8] sm:$0xff] }
 0x8f4   : > { %v3594_v36 = vpop.eup %3593 }
 0x8f5   : > { %v3596_v37 = vpop.eup %3595  ;;  %v2058_v39 = vmul.f32 %v3594_v36, %v4327_v3  ;;  %v3419_v36 = vpack.c.bf16 %v887_v35, %v886_v34  ;;  %v878_v34 = vld [vmem:[%s4260_s26 + $0x20] sm:$0xff]  ;;  %v879_v35 = vld [vmem:[%s4260_s26 + $0x28] sm:$0xff] }
 0x8f6   : > { %v2057_v38 = vmul.f32 %v3596_v37, %v4325_v2 }
 0x8f7   : > { %3420 = vmatprep.subr.bf16.mxu0 %v3419_v36 }
 0x8f8   : > { %3313 = vmatprep.mubr.msk.f32.mxu1 %vm900_vm1, %v2057_v38  ;;  %3422 = vmatpush3.bf16.msra.mxu0 %v3419_v36  ;;  %v880_v36 = vld [vmem:[%s4260_s26 + $0x30] sm:$0xff] }
 0x8f9   : > { %3314 = vmatmul.mubr.msk.f32.vlgmr.msra.gmra.mrb[12].mxu1 %vm900_vm1, %v2058_v39 }
 0x9cc   : > { %v3315_v40 = vpop.f32.mrb[12].mxu1 }
 0x9cd   : > { %2144 = vrot.lane.b32.xlu1 %v3315_v40, %s3881_s19  ;;  %v2131_v41 = vpop.f32.mrb[13].mxu1  ;;  %v888_v40 = vld [vmem:[%s4322_s16 + $0x10] sm:$0xff] }
 0x9ce   : > { %2142 = vrot.lane.b32.xlu0 %v2131_v41, %s3881_s19  ;;  %v889_v41 = vld [vmem:[%s4322_s16 + $0x18] sm:$0xff] }
 0x9d1   : > { %2155 = vrot.lane.b32.xlu1 %v3102_v42, %s3881_s19  ;;  %v3423_v42 = vpack.c.bf16 %v889_v41, %v888_v40  ;;  %v3112_v40 = vld [vmem:[%s4297_s28 + $0x1] ss:$0 sm:$0xff] }
 0x9d2   : > { %2164 = vrot.lane.b32.xlu0 %v4325_v2, %s3885_s9 }
 0x9d3   : > { %3424 = vmatprep.subr.bf16.mxu0 %v3423_v42 }
 0x9d4   : > { %3426 = vmatpush3.bf16.msra.mxu0 %v3423_v42 }
 0x9d5   : > { %2040 = vrot.lane.b32.xlu1 %v3097_v43, %s3885_s9  ;;  %v891_v43 = vld [vmem:[%s4316_s2] sm:$0xff] }
 0x9d6   : > { %2166 = vrot.lane.b32.xlu0 %v4327_v3, %s3885_s9 }
 0xa3f   : > { %v2145_v44 = vpop.permute.xlu1 %2144 }
 0xa40   : > { %v2143_v45 = vpop.permute.xlu0 %2142  ;;  %v2149_v48 = vadd.f32 %v2145_v44, %v1931_v22  ;;  %v892_v44 = vld [vmem:[%s4316_s2 + $0x8] sm:$0xff] }
 0xa41   : > { %v2148_v46 = vadd.f32 %v2143_v45, %v1926_v24  ;;  %v893_v45 = vld [vmem:[%s4316_s2 + $0x10] sm:$0xff] }
 0xa43   : > { %v2156_v47 = vpop.permute.xlu1 %2155 }
 0xa44   : > { %v2158_v49 = vadd.f32 %v2156_v47, %v2148_v46  ;;  %v2159_v50 = vadd.f32 %v2156_v47, %v2149_v48  ;;  %v2165_v61 = vpop.permute.xlu0 %2164  ;;  %v3427_v46 = vpack.c.bf16 %v892_v44, %v891_v43  ;;  %v894_v47 = vld [vmem:[%s4316_s2 + $0x18] sm:$0xff] }
 0xa46   : > { %3597 = vtanh.f32 %v2158_v49  ;;  %3428 = vmatprep.subr.bf16.mxu1 %v3427_v46 }
 0xa47   : > { %3599 = vtanh.f32 %v2159_v50  ;;  %v2041_v2 = vpop.permute.xlu1 %2040  ;;  %v3431_v50 = vpack.c.bf16 %v894_v47, %v893_v45  ;;  %3430 = vmatpush3.bf16.msra.mxu1 %v3427_v46 }
 0xa48   : > { %v2043_v53 = vsub.f32 %v2021_v26, %v2041_v2  ;;  %v2044_v54 = vsub.f32 %v2022_v25, %v2041_v2  ;;  %v2167_v6 = vpop.permute.xlu0 %2166 }
 0xa49   : > { %3432 = vmatprep.subr.bf16.mxu1 %v3431_v50 }
 0xa4a   : > { %v3098_v55 = vmul.f32 -1.442695, %v2043_v53  ;;  %v3099_v3 = vmul.f32 -1.442695, %v2044_v54 }
 0xa4b   : > { %3434 = vmatpush3.bf16.msra.mxu1 %v3431_v50 }
 0xa4c   : > { %3601 = vpow2.f32 %v3098_v55 }
 0xa4d   : > { %3603 = vpow2.f32 %v3099_v3 }
 0xa50   : > { %v3598_v51 = vpop.eup %3597 }
 0xa51   : > { %2174 = vrot.lane.b32.xlu1 %v3598_v51, %s3880_s11  ;;  %v3600_v52 = vpop.eup %3599  ;;  %v895_v51 = vld [vmem:[%s4316_s2 + $0x20] sm:$0xff] }
 0xa55   : > { %2176 = vrot.lane.b32.xlu1 %v3600_v52, %s3880_s11  ;;  %v896_v52 = vld [vmem:[%s4316_s2 + $0x28] sm:$0xff] }
 0xa56   : > { %v3602_v56 = vpop.eup %3601  ;;  %v3435_v55 = vpack.c.bf16 %v896_v52, %v895_v51 }
 0xa57   : > { %v2051_v57 = vadd.f32 1.0, %v3602_v56  ;;  %v3604_v58 = vpop.eup %3603 }
 0xa58   : > { %v2052_v59 = vadd.f32 1.0, %v3604_v58  ;;  %3436 = vmatprep.subr.bf16.mxu1 %v3435_v55 }
 0xa59   : > { %3605 = vrcp.f32 %v2051_v57  ;;  %3438 = vmatpush3.bf16.msra.mxu1 %v3435_v55 }
 0xa5a   : > { %3607 = vrcp.f32 %v2052_v59 }
 0xa63   : > { %v3606_v60 = vpop.eup %3605 }
 0xa64   : > { %v2162_v62 = vsub.f32 1.0, %v3606_v60  ;;  %v3608_v63 = vpop.eup %3607 }
 0xa65   : > { %v2163_v4 = vsub.f32 1.0, %v3608_v63 }
 0xa66   : > { %v2170_v1 = vmul.f32 %v2165_v61, %v2162_v62  ;;  %v897_v62 = vld [vmem:[%s4316_s2 + $0x30] sm:$0xff] }
 0xa67   : > { %v2171_v9 = vmul.f32 %v2167_v6, %v2163_v4  ;;  %v859_v4 = vld [vmem:[%s4287_s1 + $0x28] sm:$0xff]  ;;  %v3103_v6 = vld [vmem:[%s823_s6] ss:$0 sm:$0xff] }
 0xac3   : > { %v2175_v0 = vpop.permute.xlu1 %2174 }
 0xac4   : > { %v2180_v5 = vmul.f32 %v3606_v60, %v2175_v0 }
 0xac6   : > { %v4464_v7 = vadd.f32 %v2180_v5, %v2170_v1  ;;  %v858_v1 = vld [vmem:[%s4287_s1 + $0x20] sm:$0xff] }
 0xac7   : > { %v2177_v8 = vpop.permute.xlu1 %2176  ;;  %v3443_v5 = vpack.c.bf16 %v859_v4, %v858_v1 }
 0xac8   : > { %v2181_v10 = vmul.f32 %v3608_v63, %v2177_v8  ;;  %2186 = vrot.lane.b32.xlu0 %v4464_v7, %s3880_s11  ;;  %v898_v63 = vld [vmem:[%s4316_s2 + $0x38] sm:$0xff] }
 0xac9   : > { %v3439_v0 = vpack.c.bf16 %v898_v63, %v897_v62  ;;  %3444 = vmatprep.subr.bf16.mxu0 %v3443_v5 }
 0xaca   : > { %v4468_v11 = vadd.f32 %v2181_v10, %v2171_v9 }
 0xacb   : > { %3440 = vmatprep.subr.bf16.mxu1 %v3439_v0 }
 0xacc   : > { %2188 = vrot.lane.b32.xlu1 %v4468_v11, %s3880_s11  ;;  %3442 = vmatpush3.bf16.msra.mxu1 %v3439_v0 }
 0xb3a   : > { %v4472_v12 = vpop.permute.xlu0 %2186 }
 0xb3b   : > { %v2192_v13 = vsel %vm900_vm1, %v4472_v12, 0.0 }
 0xb3c   : > { %2193 = vadd.xlane.f32.xlu0 %v2192_v13 }
 0xb3e   : > { %v4476_v14 = vpop.permute.xlu1 %2188 }
 0xb3f   : > { %v2195_v15 = vsel %vm900_vm1, %v4476_v14, 0.0 }
 0xb40   : > { %2196 = vadd.xlane.f32.xlu1 %v2195_v15 }
 0xbc9   : > { %v2194_v16 = vpop.xlane.xlu0 %2193 }
 0xbca   : > { %v2198_v17 = vmul.f32 0.03125, %v2194_v16 }
 0xbcc   : > { %v2200_v18 = vsub.f32 %v4464_v7, %v2198_v17  ;;  %v860_v17 = vld [vmem:[%s4287_s1 + $0x30] sm:$0xff] }
 0xbcd   : > { %v2197_v19 = vpop.xlane.xlu1 %2196 }
 0xbce   : > { %v2199_v20 = vmul.f32 0.03125, %v2197_v19  ;;  %v2202_v21 = vmul.f32 %v2200_v18, %v2200_v18 }
 0xbd0   : > { %v2201_v22 = vsub.f32 %v4468_v11, %v2199_v20  ;;  %2206 = vrot.lane.b32.xlu0 %v2202_v21, %s3880_s11  ;;  %v868_v20 = vld [vmem:[%s4258_s17 + $0x20] sm:$0xff]  ;;  %v869_v21 = vld [vmem:[%s4258_s17 + $0x28] sm:$0xff] }
 0xbd2   : > { %v2203_v23 = vmul.f32 %v2201_v22, %v2201_v22 }
 0xbd4   : > { %2208 = vrot.lane.b32.xlu1 %v2203_v23, %s3880_s11  ;;  %v3106_v23 = vld [vmem:[%s831_s7] ss:$0 sm:$0xff] }
 0xc42   : > { %v2207_v24 = vpop.permute.xlu0 %2206 }
 0xc43   : > { %v2212_v25 = vsel %vm900_vm1, %v2207_v24, 0.0 }
 0xc44   : > { %2213 = vadd.xlane.f32.xlu0 %v2212_v25  ;;  %v870_v25 = vld [vmem:[%s4258_s17 + $0x30] sm:$0xff] }
 0xc46   : > { %v2209_v26 = vpop.permute.xlu1 %2208 }
 0xc47   : > { %v2215_v27 = vsel %vm900_vm1, %v2209_v26, 0.0  ;;  %v871_v26 = vld [vmem:[%s4258_s17 + $0x38] sm:$0xff] }
 0xc48   : > { %2216 = vadd.xlane.f32.xlu1 %v2215_v27 }
 0xc59   : > { %2241 = vrot.lane.b32.xlu1 %v2239_v31, %s3885_s9 }
 0xc5a   : > { %2231 = vrot.lane.b32.xlu0 %v2229_v33, %s3885_s9  ;;  %v3455_v33 = vpack.c.bf16 %v871_v26, %v870_v25 }
 0xcd1   : > { %v2214_v37 = vpop.xlane.xlu0 %2213 }
 0xcd2   : > { %v2218_v38 = vmul.f32 0.03125, %v2214_v37  ;;  %v3459_v37 = vpack.c.bf16 %v879_v35, %v878_v34 }
 0xcd4   : > { %v2220_v32 = vadd.f32 1e-06, %v2218_v38  ;;  %v881_v38 = vld [vmem:[%s4260_s26 + $0x38] sm:$0xff]  ;;  %3460 = vmatprep.subr.bf16.mxu1 %v3459_v37 }
 0xcd5   : > { %v2217_v28 = vpop.xlane.xlu1 %2216  ;;  %v2232_v49 = vpop.permute.xlu0 %2231 }
 0xcd6   : > { %3609 = vrsqrt.f32 %v2220_v32  ;;  %v2219_v30 = vmul.f32 0.03125, %v2217_v28  ;;  %v3463_v32 = vpack.c.bf16 %v881_v38, %v880_v36 }
 0xcd8   : > { %v2221_v39 = vadd.f32 1e-06, %v2219_v30 }
 0xcd9   : > { %v2242_v53 = vpop.permute.xlu1 %2241 }
 0xcda   : > { %3611 = vrsqrt.f32 %v2221_v39  ;;  %v3109_v39 = vld [vmem:[%s4690_s10 + $0x1] ss:$0 sm:$0xff] }
 0xce0   : > { %v3610_v48 = vpop.eup %3609 }
 0xce1   : > { %v2224_v2 = vmul.f32 %v3610_v48, %v2200_v18  ;;  %v861_v18 = vld [vmem:[%s4287_s1 + $0x38] sm:$0xff] }
 0xce2   : > { %v3447_v19 = vpack.c.bf16 %v861_v18, %v860_v17 }
 0xce3   : > { %v2234_v54 = vmul.f32 %v2232_v49, %v2224_v2 }
 0xce4   : > { %v3612_v3 = vpop.eup %3611 }
 0xce5   : > { %v2225_v56 = vmul.f32 %v3612_v3, %v2201_v22  ;;  %v2244_v57 = vadd.f32 %v2242_v53, %v2234_v54  ;;  %v3451_v22 = vpack.c.bf16 %v869_v21, %v868_v20 }
 0xce7   : > { %v2235_v58 = vmul.f32 %v2232_v49, %v2225_v56  ;;  %2254 = vrot.lane.b32.xlu0 %v2244_v57, %s3880_s11 }
 0xce9   : > { %v2245_v59 = vadd.f32 %v2242_v53, %v2235_v58 }
 0xceb   : > { %2256 = vrot.lane.b32.xlu1 %v2245_v59, %s3880_s11  ;;  %v3117_v59 = vld [vmem:[%s4307_s24 + $0x1] ss:$0 sm:$0xff] }
 0xd59   : > { %v2255_v60 = vpop.permute.xlu0 %2254 }
 0xd5a   : > { %3324 = vmatprep.mubr.msk.f32.mxu0 %vm900_vm1, %v2255_v60  ;;  %v3122_v60 = vld [vmem:[%s4302_s12 + $0x1] ss:$0 sm:$0xff] }
 0xd5d   : > { %v2257_v61 = vpop.permute.xlu1 %2256 }
 0xd5e   : > { %3325 = vmatmul.mubr.msk.f32.vlgmr.msra.gmra.mrb[12].mxu0 %vm900_vm1, %v2257_v61 }
 0xd5f   : > { %3446 = vmatpush3.bf16.msra.mxu0 %v3443_v5 }
 0xd60   : > { %3448 = vmatprep.subr.bf16.mxu0 %v3447_v19 }
 0xd63   : > { %3450 = vmatpush3.bf16.msra.mxu0 %v3447_v19 }
 0xd64   : > { %3452 = vmatprep.subr.bf16.mxu0 %v3451_v22 }
 0xe31   : > { %v3326_v8 = vpop.f32.mrb[12].mxu0 }
 0xe32   : > { %v2334_v9 = vadd.f32 %v3326_v8, %v3103_v6  ;;  %v2328_v10 = vpop.f32.mrb[13].mxu0 }
 0xe33   : > { %v2329_v13 = vadd.f32 %v3103_v6, %v2328_v10 }
 0xe34   : > { %v2338_v16 = vmax.f32 %v2334_v9, 0.0 }
 0xe35   : > { %v2337_v15 = vmax.f32 %v2329_v13, 0.0 }
 0xe37   : > { %3343 = vmatprep.mubr.msk.f32.mxu1 %vm2345_vm5, %v2337_v15 }
 0xe38   : > { %3344 = vmatmul.mubr.msk.f32.vlgmr.msra.gmra.mrb[14].mxu1 %vm2345_vm5, %v2338_v16 }
 0xe39   : > { %3462 = vmatpush3.bf16.msra.mxu1 %v3459_v37 }
 0xe3a   : > { %3464 = vmatprep.subr.bf16.mxu1 %v3463_v32 }
 0xe3d   : > { %3466 = vmatpush3.bf16.msra.mxu1 %v3463_v32 }
 0xf0b   : > { %v3345_v24 = vpop.f32.mrb[14].mxu1 }
 0xf0c   : > { %v2418_v27 = vpop.f32.mrb[15].mxu1  ;;  %v2424_v31 = vadd.f32 %v3345_v24, %v3106_v23 }
 0xf0d   : > { %v2419_v29 = vadd.f32 %v3106_v23, %v2418_v27 }
 0xf0f   : > { %3354 = vmatprep.mubr.msk.f32.mxu0 %vm900_vm1, %v2419_v29 }
 0xf10   : > { %3355 = vmatmul.mubr.msk.f32.vlgmr.msra.gmra.mrb[14].mxu0 %vm900_vm1, %v2424_v31 }
 0xf11   : > { %3454 = vmatpush3.bf16.msra.mxu0 %v3451_v22  ;;  %3365 = vmatprep.mubr.msk.f32.mxu0 %vm900_vm1, %v4472_v12 }
 0xf12   : > { %3456 = vmatprep.subr.bf16.mxu0 %v3455_v33 }
 0xf15   : > { %3458 = vmatpush3.bf16.msra.mxu0 %v3455_v33 }
 0xf18   : > { %3366 = vmatmul.mubr.msk.f32.vlgmr.msra.gmra.mrb[16].mxu0 %vm900_vm1, %v4476_v14 }
 0xfe3   : > { %v3356_v28 = vpop.f32.mrb[14].mxu0 }
 0xfe4   : > { %v2505_v30 = vpop.f32.mrb[15].mxu0  ;;  %v2511_v42 = vadd.f32 %v3356_v28, %v3109_v39 }
 0xfe5   : > { %v2506_v45 = vadd.f32 %v3109_v39, %v2505_v30 }
 0xfeb   : > { %v3367_v41 = vpop.f32.mrb[16].mxu0 }
 0xfec   : > { %v2596_v43 = vadd.f32 %v3367_v41, %v3112_v40  ;;  %v2590_v44 = vpop.f32.mrb[17].mxu0 }
 0xfed   : > { %v2591_v46 = vadd.f32 %v3112_v40, %v2590_v44 }
 0xfee   : > { %v2600_v47 = vadd.f32 %v2596_v43, %v2511_v42 }
 0xfef   : > { %v2599_v48 = vadd.f32 %v2591_v46, %v2506_v45 }
 0xff0   : > { %v3116_v49 = vmul.f32 -1.442695, %v2600_v47 }
 0xff1   : > { %v3115_v50 = vmul.f32 -1.442695, %v2599_v48 }
 0xff2   : > { %3613 = vpow2.f32 %v3116_v49 }
 0xff3   : > { %3615 = vpow2.f32 %v3115_v50 }
 0xffc   : > { %v3614_v51 = vpop.eup %3613 }
 0xffd   : > { %v3616_v52 = vpop.eup %3615  ;;  %v2608_v2 = vadd.f32 1.0, %v3614_v51 }
 0xffe   : > { %v2607_v53 = vadd.f32 1.0, %v3616_v52 }
 0xfff   : > { %3617 = vrcp.f32 %v2608_v2 }
0x1000   : > { %3619 = vrcp.f32 %v2607_v53 }
0x1009   : > { %v3618_v54 = vpop.eup %3617 }
0x100a   : > { %v3620_v55 = vpop.eup %3619  ;;  %v2636_v56 = vmul.f32 %v3618_v54, %v4476_v14 }
0x100b   : > { %v2635_v3 = vmul.f32 %v3620_v55, %v4472_v12 }
0x100d   : > { %3376 = vmatprep.mubr.msk.f32.mxu1 %vm900_vm1, %v2635_v3 }
0x100e   : > { %3377 = vmatmul.mubr.msk.f32.vlgmr.msra.gmra.mrb[16].mxu1 %vm900_vm1, %v2636_v56 }
0x10e1   : > { %v3378_v57 = vpop.f32.mrb[16].mxu1 }
0x10e2   : > { %2722 = vrot.lane.b32.xlu1 %v3378_v57, %s3881_s19  ;;  %v2709_v58 = vpop.f32.mrb[17].mxu1 }
0x10e3   : > { %2720 = vrot.lane.b32.xlu0 %v2709_v58, %s3881_s19 }
0x10e6   : > { %2618 = vrot.lane.b32.xlu1 %v3117_v59, %s3885_s9 }
0x10e7   : > { %2733 = vrot.lane.b32.xlu0 %v3122_v60, %s3881_s19 }
0x1154   : > { %v2723_v12 = vpop.permute.xlu1 %2722 }
0x1155   : > { %v2721_v61 = vpop.permute.xlu0 %2720  ;;  %v2727_v14 = vadd.f32 %v2723_v12, %v2511_v42 }
0x1156   : > { %v2726_v62 = vadd.f32 %v2721_v61, %v2506_v45 }
0x1158   : > { %v2619_v6 = vpop.permute.xlu1 %2618 }
0x1159   : > { %v2734_v63 = vpop.permute.xlu0 %2733  ;;  %v2621_v8 = vsub.f32 %v2599_v48, %v2619_v6  ;;  %v2622_v9 = vsub.f32 %v2600_v47, %v2619_v6 }
0x115a   : > { %v2736_v0 = vadd.f32 %v2734_v63, %v2726_v62  ;;  %v2737_v1 = vadd.f32 %v2734_v63, %v2727_v14 }
0x115b   : > { %v3118_v10 = vmul.f32 -1.442695, %v2621_v8  ;;  %v3119_v13 = vmul.f32 -1.442695, %v2622_v9 }
0x115c   : > { %3621 = vtanh.f32 %v2736_v0 }
0x115d   : > { %3623 = vtanh.f32 %v2737_v1 }
0x115e   : > { %3625 = vpow2.f32 %v3118_v10 }
0x115f   : > { %3627 = vpow2.f32 %v3119_v13 }
0x1166   : > { %v3622_v4 = vpop.eup %3621 }
0x1167   : > { %2746 = vrot.lane.b32.xlu0 %v3622_v4, %s3880_s11  ;;  %v3624_v5 = vpop.eup %3623 }
0x1168   : > { %2748 = vrot.lane.b32.xlu1 %v3624_v5, %s3880_s11  ;;  %v3626_v15 = vpop.eup %3625 }
0x1169   : > { %v3628_v16 = vpop.eup %3627  ;;  %v2629_v17 = vadd.f32 1.0, %v3626_v15 }
0x116a   : > { %v2630_v18 = vadd.f32 1.0, %v3628_v16 }
0x116b   : > { %3629 = vrcp.f32 %v2629_v17 }
0x116c   : > { %3631 = vrcp.f32 %v2630_v18 }
0x1175   : > { %v3630_v19 = vpop.eup %3629 }
0x1176   : > { %v3632_v20 = vpop.eup %3631  ;;  %v2740_v21 = vsub.f32 1.0, %v3630_v19 }
0x1177   : > { %v2741_v22 = vsub.f32 1.0, %v3632_v20 }
0x1178   : > { %v2742_v24 = vmul.f32 %v2740_v21, %v4464_v7 }
0x1179   : > { %v2743_v29 = vmul.f32 %v2741_v22, %v4468_v11 }
0x11d9   : > { %v2747_v23 = vpop.permute.xlu0 %2746 }
0x11da   : > { %v2752_v25 = vmul.f32 %v3630_v19, %v2747_v23  ;;  %v2749_v26 = vpop.permute.xlu1 %2748 }
0x11db   : > { %v2753_v31 = vmul.f32 %v3632_v20, %v2749_v26 }
0x11dc   : > { %v2754_v27 = vadd.f32 %v2752_v25, %v2742_v24 }
0x11dd   : > { %v2755_v33 = vadd.f32 %v2753_v31, %v2743_v29 }
0x11de   : > { %2758 = vrot.lane.b32.xlu0 %v2754_v27, %s3880_s11 }
0x11df   : > { %2760 = vrot.lane.b32.xlu1 %v2755_v33, %s3880_s11 }
0x124c   : > { %2769 = sbr.rel (%p3123_p2) target bundleno = 4691 (0x1253), region = 108 }
0x1250   : > { %v2759_v34 = vpop.permute.xlu0 %2758 }
0x1251   : > { %2764 = vst.msk [vmem:[#allocation2] sm:$0xff] %vm900_vm1, %v2759_v34  ;;  %v2761_v35 = vpop.permute.xlu1 %2760  ;;  %2770 = vst.msk [vmem:[#allocation12] sm:$0xff] (!%p3123_p2), %vm900_vm1, %v2759_v34 }
0x1252   : > { %2765 = vst.msk [vmem:[#allocation2 + $0x8] sm:$0xff] %vm900_vm1, %v2761_v35  ;;  %2771 = vst.msk [vmem:[#allocation12 + $0x8] sm:$0xff] (!%p3123_p2), %vm900_vm1, %v2761_v35 }
0x1253 PF: > { %s4693_s17 = sld [smem:[#allocation23_spill]]  ;;  %s3886_s26 = smov [#allocation12]  }
0x1254   : > { %s2781_s13 = sshll.u32 %s3886_s26, 4  ;;  %s2782_s13 = int_to_ptr.vmem [resolvable:$true] %s2781_s13 }
0x1255   : > { %s3781_s1 = scalar_lea.vmem %s2782_s13, 256  ;;  %p3788_p0 = scmp.lt.s32.totalorder %s2782_s13, %s2782_s13 }
0x1256   : > { %p3782_p3 = scmp.ne.s32.totalorder %s2782_s13, %s3781_s1  ;;  %p3789_p5 = scmp.lt.s32.totalorder %s3781_s1, %s3781_s1 }
0x1258   : > { %p3790_p12 = por %p3789_p5, %p3788_p0 }
0x1259   : > { %p3505_p6 = scmp.eq.s32.totalorder %s4693_s17, 1 }
0x125b   : > { %p3783_p9 = pnand %p3782_p3, %p3505_p6 }
0x125d   : > { %p3784_p13 = pneg %p3783_p9 }
0x125f   : > { %p3791_p8 = pnand %p3790_p12, %p3784_p13 }
0x1261   : > { %3794 = shalt.err (!%p3791_p8)
}
0x1262   : > { %s4694_s12 = sld [smem:[#allocation40_spill]] }
0x1268   : > { %s3795_s5 = scalar_lea.hbm %s4694_s12, 256 }
0x1269   : > { %p3796_p11 = scmp.ne.s32.totalorder %s4694_s12, %s3795_s5  ;;  %p3801_p7 = scmp.lt.u32.totalorder %s3795_s5, %s4694_s12 }
0x126b   : > { %p3797_p4 = pnand %p3796_p11, %p3505_p6 }
0x126d   : > { %p3798_p10 = pneg %p3797_p4 }
0x126f   : > { %p3803_p1 = pnand %p3801_p7, %p3798_p10 }
0x1271   : > { %3806 = shalt.err (!%p3803_p1)
}
0x1272   : > { %s3887_s8 = smov 128   ;;  %s3888_s2 = smov 8  }
0x1273   : > { %3482 = dma.vmem_to_hbm [thread:$0]  (%p3505_p6), %s2782_s13, 256, %s4694_s12, [#allocation5], %s3887_s8, %s3887_s8, %s3888_s2  }
0x1274   : > { %3844 = dma.done.wait (%p3505_p6), [#allocation5], 256  }
0x1275   : > { %3846 = vsyncadd (%p3505_p6), [#allocation5], 4294967040 }
0x1276 PF: > { %s4695_s7 = sld [smem:[#allocation20_spill]]  ;;  %s4696_s18 = sld [smem:[#allocation17_spill]] }
0x1277   : > { %s4697_s19 = sld [smem:[#allocation18_spill]]  ;;  %s4698_s20 = sld [smem:[#allocation22_spill]] }
0x1278   : > { %s4699_s21 = sld [smem:[#allocation19_spill]]  ;;  %s4700_s22 = sld [smem:[#allocation21_spill]] }
0x127c   : > { %s33_s23 = sadd.s32 1, %s4695_s7  }
0x127d   : > { %p30_p2 = scmp.ge.s32.totalorder %s33_s23, 4  }
0x127f   :  { %32 = sbr.rel (!%p30_p2) target bundleno = 25 (0x19), region = 197 }
0x1286   :  { %2797 = vsyncpa [#allocation4], 1 }
0x1287   :  { %2799 = vsyncpa [#allocation4 + $0x1], 1 }
0x1288   :  { %2800 = vsyncpa [#allocation7], 1 }
0x1289   :  { %2802 = vsyncpa [#allocation7 + $0x1], 1 }
0x128a   :  { %2803 = vsyncpa [#allocation10], 1 }
0x128b   :  { %2805 = vsyncpa [#allocation10 + $0x1], 1 }
0x128c   :  { %2806 = vsyncpa [#allocation5], 1 }
0x128d   :  { %2808 = vsyncpa [#allocation5 + $0x1], 1 }

</bundles_post_ra>
